<compile_context>
chip_gen: v5e
topology: v5e:2x2
jax: 0.10.0
libtpu: 0.0.40
codegen_flags: <defaults>
</compile_context>

<pallas_src>
import numpy as np
import jax
import jax.numpy as jnp
from jax.experimental import pallas as pl
from jax.experimental.pallas import tpu as pltpu

C_OUT, K, L_IN, P = 32, 9, 10, 5      # conv channels, kernel size, seq len, pooled len
F_FLAT = C_OUT * P                    # 160 = fc1 in_features
F_PAD = 256                           # 160 padded to 2 lane tiles
H1 = 256                              # fc1 out_features
OUT_PAD = 128                         # fc2 out_features (1) padded to one lane tile


def convnet_kernel(x_ref, wc_ref, bc_ref, w1_ref, b1_ref, w2_ref, b2_ref, out_ref):
    x = x_ref[...].astype(jnp.bfloat16)                                    # (TB, 10)
    # Conv1d at even|odd output positions as ONE MXU matmul: (TB,10) @ (10,512)
    conv = jnp.dot(x, wc_ref[...], preferred_element_type=jnp.float32)     # (TB, 512)
    ce, co = conv[:, :F_PAD], conv[:, F_PAD:]                              # lane-aligned slices
    # pool(relu(conv)) == relu(max(even+b, odd+b)) == relu(max(even, odd) + b)
    pooled = jnp.maximum(jnp.maximum(ce, co) + bc_ref[...], 0.0)           # (TB, 256)
    # fc1 + ReLU : (TB,256) @ (256,256)
    h = jnp.maximum(
        jnp.dot(pooled.astype(jnp.bfloat16), w1_ref[...],
                preferred_element_type=jnp.float32) + b1_ref[...], 0.0)    # (TB, 256)
    # TODO(synk): nn.Dropout(p=0.5) is identity at inference; training-mode dropout would
    # need pltpu.prng_seed / pltpu.prng_random_bits and is not implemented here.
    # fc2 : (TB,256) @ (256,128); only lane 0 is the real logit, lanes 1..127 are exactly 0.
    logits = jnp.dot(h.astype(jnp.bfloat16), w2_ref[...],
                     preferred_element_type=jnp.float32) + b2_ref[...]     # (TB, 128)
    # Compact the single valid lane into a lane-dense (TB//128, 128) tile BEFORE sigmoid:
    # 128x128 XLU transpose per 128 batch rows; row 0 of the transposed block holds the
    # 128 logits of that row-group.
    tb = logits.shape[0]
    rows = []
    for i in range(tb // 128):
        blk = logits[i * 128:(i + 1) * 128, :]                             # (128, 128)
        rows.append(jnp.transpose(blk)[0:1, :])                            # (1, 128)
    compact = rows[0] if len(rows) == 1 else jnp.concatenate(rows, axis=0)  # (TB//128, 128)
    out_ref[...] = jax.nn.sigmoid(compact)[None, :, :]                     # (1, TB//128, 128)


def init_params(key):
    """Deterministic parameters in PyTorch layouts."""
    ks = jax.random.split(key, 6)
    wc = jax.random.normal(ks[0], (C_OUT, 1, K), jnp.float32) * 0.10   # conv1.weight
    bc = jax.random.normal(ks[1], (C_OUT,), jnp.float32) * 0.10        # conv1.bias
    w1 = jax.random.normal(ks[2], (H1, F_FLAT), jnp.float32) * 0.05    # fc1.weight
    b1 = jax.random.normal(ks[3], (H1,), jnp.float32) * 0.05           # fc1.bias
    w2 = jax.random.normal(ks[4], (1, H1), jnp.float32) * 0.05         # fc2.weight
    b2 = jax.random.normal(ks[5], (1,), jnp.float32) * 0.05            # fc2.bias
    return wc, bc, w1, b1, w2, b2


def pack_params(params):
    """PyTorch-layout params -> kernel-layout operands (one-time glue, bf16 matmul weights)."""
    wc, bc, w1, b1, w2, b2 = (np.asarray(p, np.float32) for p in params)
    # Fold zero-pad(4) + im2col + even/odd pooling positions into one (10, 512) matrix:
    # column (par*F_PAD + c*5 + p) maps x -> conv output at position l = 2p + par, channel c.
    wc_big = np.zeros((L_IN, 2 * F_PAD), np.float32)
    bc_big = np.zeros((1, F_PAD), np.float32)
    for c in range(C_OUT):
        for p in range(P):
            col = c * P + p
            bc_big[0, col] = bc[c]
            for par in (0, 1):                     # even / odd conv output position
                l = 2 * p + par
                for j in range(L_IN):
                    k = j - l + 4                  # kernel tap that touches input element j
                    if 0 <= k < K:
                        wc_big[j, par * F_PAD + col] = wc[c, 0, k]
    w1k = np.zeros((F_PAD, H1), np.float32)
    w1k[:F_FLAT, :] = w1.T                         # padded rows (160:256) are zero
    w2k = np.zeros((H1, OUT_PAD), np.float32)
    w2k[:, 0] = w2[0, :]                           # real output in lane 0 only
    b2k = np.zeros((1, OUT_PAD), np.float32)
    b2k[0, 0] = b2[0]
    return (jnp.asarray(wc_big, jnp.bfloat16), jnp.asarray(bc_big, jnp.float32),
            jnp.asarray(w1k, jnp.bfloat16), jnp.asarray(b1[None, :], jnp.float32),
            jnp.asarray(w2k, jnp.bfloat16), jnp.asarray(b2k, jnp.float32))


def _round_up(n, m):
    return (n + m - 1) // m * m


def convnet_forward(x, packed, *, max_tb=2048):
    """x: (B, 10) float32  ->  (B,) float32 (sigmoid outputs)."""
    wc_big, bc_big, w1k, b1k, w2k, b2k = packed
    B = x.shape[0]
    assert x.shape[1] == L_IN, "fc1(160) implies input sequence length 10"
    # Batch tile: multiple of 128 (unmasked sublane handling + output compaction).
    max_tb = max(128, (max_tb // 128) * 128)
    b128 = _round_up(B, 128)
    tb = min(max_tb, b128)
    if b128 > 256:
        # Keep >= 2 grid steps so both v7x TensorCores get work on the "parallel" axis
        # (no-op on single-core v5e/v6e).
        tb = min(tb, _round_up(-(-b128 // 2), 128))
    b_pad = _round_up(b128, tb)
    if b_pad != B:
        x = jnp.pad(x, ((0, b_pad - B), (0, 0)))
    grid_len = b_pad // tb

    # Advisory cost estimate so XLA schedules neighbouring ops around the custom call.
    weights = (wc_big, bc_big, w1k, b1k, w2k, b2k)
    cost = pl.CostEstimate(
        flops=2 * b_pad * (L_IN * 2 * F_PAD + F_PAD * H1 + H1 * OUT_PAD),
        transcendentals=b_pad,
        bytes_accessed=b_pad * L_IN * 4 + b_pad * 4
        + sum(int(w.size) * w.dtype.itemsize for w in weights))

    const = lambda i: (0, 0)   # weights/biases: same block every step -> stay VMEM-resident
    out = pl.pallas_call(
        convnet_kernel,
        out_shape=jax.ShapeDtypeStruct((grid_len, tb // 128, 128), jnp.float32),
        grid=(grid_len,),
        in_specs=[
            pl.BlockSpec((tb, L_IN), lambda i: (i, 0)),   # activation tile (pipelined)
            pl.BlockSpec(wc_big.shape, const),
            pl.BlockSpec(bc_big.shape, const),
            pl.BlockSpec(w1k.shape, const),
            pl.BlockSpec(b1k.shape, const),
            pl.BlockSpec(w2k.shape, const),
            pl.BlockSpec(b2k.shape, const),
        ],
        # Compacted, lane-dense output: one 128-lane f32 row per 128 batch rows.
        out_specs=pl.BlockSpec((1, tb // 128, 128), lambda i: (i, 0, 0)),
        compiler_params=pltpu.CompilerParams(
            dimension_semantics=("parallel",),           # megacore split on v7x
            vmem_limit_bytes=32 * 1024 * 1024),
        cost_estimate=cost,
    )(x, wc_big, bc_big, w1k, b1k, w2k, b2k)
    return out.reshape(-1)[:B]   # torch .squeeze()


def reference_forward(x, params):
    """Plain-JAX replica of the PyTorch forward (f32, for correctness check)."""
    wc, bc, w1, b1, w2, b2 = params
    B = x.shape[0]
    xp = jnp.pad(x, ((0, 0), (4, 4)))
    patches = jnp.stack([xp[:, l:l + K] for l in range(L_IN)], axis=1)    # (B, 10, 9)
    conv = jnp.einsum('blk,ck->bcl', patches, wc[:, 0, :]) + bc[None, :, None]
    r = jnp.maximum(conv, 0.0)
    pooled = jnp.maximum(r[:, :, 0::2], r[:, :, 1::2])                    # (B, 32, 5)
    flat = pooled.reshape(B, -1)                                          # (B, 160)
    h = jnp.maximum(flat @ w1.T + b1, 0.0)
    out = jax.nn.sigmoid(h @ w2.T + b2)
    return out[:, 0]


if __name__ == "__main__":
    key = jax.random.PRNGKey(0)
    pkey, xkey = jax.random.split(key)
    params = init_params(pkey)
    packed = pack_params(params)

    # Case 1: multi-step tiled path with compaction across two 128-row groups per tile:
    # B=300 -> b128=384 (>256) -> tb=256, b_pad=512, grid=(2,), out block (1, 2, 128).
    B = 300
    x = jax.random.normal(xkey, (B, L_IN), jnp.float32)
    y = jax.block_until_ready(convnet_forward(x, packed, max_tb=256))
    y_ref = reference_forward(x, params)
    assert y.shape == (B,), y.shape
    # bf16 matmul operands -> loosened tolerance vs the pure-f32 reference.
    assert jnp.allclose(y, y_ref, atol=2e-2, rtol=2e-2), (y, y_ref)

    # Case 2: small batch on the default tile: B=20 -> tb=128, grid=(1,), padded rows sliced off.
    B2 = 20
    x2 = jax.random.normal(jax.random.PRNGKey(2), (B2, L_IN), jnp.float32)
    y2 = jax.block_until_ready(convnet_forward(x2, packed))
    y2_ref = reference_forward(x2, params)
    assert y2.shape == (B2,), y2.shape
    assert jnp.allclose(y2, y2_ref, atol=2e-2, rtol=2e-2), (y2, y2_ref)

    print("KERNEL_OK")
</pallas_src>

<mosaic_0001>
module attributes {stable_mosaic.version = 11 : i64} {
  func.func @convnet_kernel(%arg0: i32, %arg1: memref<256x10xf32, #tpu.memory_space<vmem>>, %arg2: memref<10x512xbf16, #tpu.memory_space<vmem>>, %arg3: memref<1x256xf32, #tpu.memory_space<vmem>>, %arg4: memref<256x256xbf16, #tpu.memory_space<vmem>>, %arg5: memref<1x256xf32, #tpu.memory_space<vmem>>, %arg6: memref<256x128xbf16, #tpu.memory_space<vmem>>, %arg7: memref<1x128xf32, #tpu.memory_space<vmem>>, %arg8: memref<1x2x128xf32, #tpu.memory_space<vmem>>) attributes {dimension_semantics = [#tpu.dimension_semantics<parallel>], iteration_bounds = array<i64: 2>, scalar_prefetch = 0 : i64, scratch_operands = 0 : i64, tpu.core_type = #tpu.core_type<tc>, window_params = [{transform_indices = @transform_0, window_bounds = array<i64: 256, 10>}, {pipeline_mode = #tpu.pipeline_mode<synchronous>, transform_indices = @transform_1, window_bounds = array<i64: 10, 512>}, {pipeline_mode = #tpu.pipeline_mode<synchronous>, transform_indices = @transform_2, window_bounds = array<i64: 1, 256>}, {pipeline_mode = #tpu.pipeline_mode<synchronous>, transform_indices = @transform_3, window_bounds = array<i64: 256, 256>}, {pipeline_mode = #tpu.pipeline_mode<synchronous>, transform_indices = @transform_4, window_bounds = array<i64: 1, 256>}, {pipeline_mode = #tpu.pipeline_mode<synchronous>, transform_indices = @transform_5, window_bounds = array<i64: 256, 128>}, {pipeline_mode = #tpu.pipeline_mode<synchronous>, transform_indices = @transform_6, window_bounds = array<i64: 1, 128>}, {transform_indices = @transform_7, window_bounds = array<i64: 1, 2, 128>}]} {
    %c0 = arith.constant 0 : index
    %c0_0 = arith.constant 0 : index
    %0 = vector.load %arg1[%c0, %c0_0] : memref<256x10xf32, #tpu.memory_space<vmem>>, vector<256x10xf32>
    %1 = arith.truncf %0 : vector<256x10xf32> to vector<256x10xbf16>
    %c0_1 = arith.constant 0 : index
    %c0_2 = arith.constant 0 : index
    %2 = vector.load %arg2[%c0_1, %c0_2] : memref<10x512xbf16, #tpu.memory_space<vmem>>, vector<10x512xbf16>
    %cst = arith.constant dense<0.000000e+00> : vector<256x512xf32>
    %3 = tpu.matmul %1, %2, %cst {dimension_numbers = #tpu.dot_dimension_numbers<[1], [0], [0], [1], [0, 0, 1, 1], [], []>} : vector<256x10xbf16>, vector<10x512xbf16>, vector<256x512xf32> -> vector<256x512xf32>
    %4 = vector.extract_strided_slice %3 {offsets = [0, 0], sizes = [256, 256], strides = [1, 1]} : vector<256x512xf32> to vector<256x256xf32>
    %5 = vector.extract_strided_slice %3 {offsets = [0, 256], sizes = [256, 256], strides = [1, 1]} : vector<256x512xf32> to vector<256x256xf32>
    %6 = arith.maximumf %4, %5 : vector<256x256xf32>
    %c0_3 = arith.constant 0 : index
    %c0_4 = arith.constant 0 : index
    %7 = vector.load %arg3[%c0_3, %c0_4] : memref<1x256xf32, #tpu.memory_space<vmem>>, vector<1x256xf32>
    %8 = vector.broadcast %7 : vector<1x256xf32> to vector<256x256xf32>
    %9 = arith.addf %6, %8 : vector<256x256xf32>
    %cst_5 = arith.constant 0.000000e+00 : f32
    %10 = vector.broadcast %cst_5 : f32 to vector<256x256xf32>
    %11 = arith.maximumf %9, %10 : vector<256x256xf32>
    %12 = arith.truncf %11 : vector<256x256xf32> to vector<256x256xbf16>
    %c0_6 = arith.constant 0 : index
    %c0_7 = arith.constant 0 : index
    %13 = vector.load %arg4[%c0_6, %c0_7] : memref<256x256xbf16, #tpu.memory_space<vmem>>, vector<256x256xbf16>
    %cst_8 = arith.constant dense<0.000000e+00> : vector<256x256xf32>
    %14 = tpu.matmul %12, %13, %cst_8 {dimension_numbers = #tpu.dot_dimension_numbers<[1], [0], [0], [1], [0, 0, 1, 1], [], []>} : vector<256x256xbf16>, vector<256x256xbf16>, vector<256x256xf32> -> vector<256x256xf32>
    %c0_9 = arith.constant 0 : index
    %c0_10 = arith.constant 0 : index
    %15 = vector.load %arg5[%c0_9, %c0_10] : memref<1x256xf32, #tpu.memory_space<vmem>>, vector<1x256xf32>
    %16 = vector.broadcast %15 : vector<1x256xf32> to vector<256x256xf32>
    %17 = arith.addf %14, %16 : vector<256x256xf32>
    %cst_11 = arith.constant 0.000000e+00 : f32
    %18 = vector.broadcast %cst_11 : f32 to vector<256x256xf32>
    %19 = arith.maximumf %17, %18 : vector<256x256xf32>
    %20 = arith.truncf %19 : vector<256x256xf32> to vector<256x256xbf16>
    %c0_12 = arith.constant 0 : index
    %c0_13 = arith.constant 0 : index
    %21 = vector.load %arg6[%c0_12, %c0_13] : memref<256x128xbf16, #tpu.memory_space<vmem>>, vector<256x128xbf16>
    %cst_14 = arith.constant dense<0.000000e+00> : vector<256x128xf32>
    %22 = tpu.matmul %20, %21, %cst_14 {dimension_numbers = #tpu.dot_dimension_numbers<[1], [0], [0], [1], [0, 0, 1, 1], [], []>} : vector<256x256xbf16>, vector<256x128xbf16>, vector<256x128xf32> -> vector<256x128xf32>
    %c0_15 = arith.constant 0 : index
    %c0_16 = arith.constant 0 : index
    %23 = vector.load %arg7[%c0_15, %c0_16] : memref<1x128xf32, #tpu.memory_space<vmem>>, vector<1x128xf32>
    %24 = vector.broadcast %23 : vector<1x128xf32> to vector<256x128xf32>
    %25 = arith.addf %22, %24 : vector<256x128xf32>
    %26 = vector.extract_strided_slice %25 {offsets = [0, 0], sizes = [128, 128], strides = [1, 1]} : vector<256x128xf32> to vector<128x128xf32>
    %27 = tpu.transpose %26, [1, 0] : vector<128x128xf32> -> vector<128x128xf32>
    %28 = vector.extract_strided_slice %27 {offsets = [0, 0], sizes = [1, 128], strides = [1, 1]} : vector<128x128xf32> to vector<1x128xf32>
    %29 = vector.extract_strided_slice %25 {offsets = [128, 0], sizes = [128, 128], strides = [1, 1]} : vector<256x128xf32> to vector<128x128xf32>
    %30 = tpu.transpose %29, [1, 0] : vector<128x128xf32> -> vector<128x128xf32>
    %31 = vector.extract_strided_slice %30 {offsets = [0, 0], sizes = [1, 128], strides = [1, 1]} : vector<128x128xf32> to vector<1x128xf32>
    %32 = tpu.concatenate %28, %31 in 0 : vector<1x128xf32>, vector<1x128xf32> -> vector<2x128xf32>
    %33 = arith.negf %32 : vector<2x128xf32>
    %34 = math.exp %33 : vector<2x128xf32>
    %cst_17 = arith.constant 1.000000e+00 : f32
    %35 = vector.broadcast %cst_17 : f32 to vector<2x128xf32>
    %36 = arith.addf %35, %34 : vector<2x128xf32>
    %37 = arith.divf %35, %36 : vector<2x128xf32>
    %38 = vector.shape_cast %37 : vector<2x128xf32> to vector<1x2x128xf32>
    %c0_18 = arith.constant 0 : index
    %c0_19 = arith.constant 0 : index
    %c0_20 = arith.constant 0 : index
    %39 = vector.load %arg8[%c0_18, %c0_19, %c0_20] : memref<1x2x128xf32, #tpu.memory_space<vmem>>, vector<1x2x128xf32>
    tpu.vector_store %arg8[%c0_18, %c0_19, %c0_20], %38 {strides = array<i32>} : memref<1x2x128xf32, #tpu.memory_space<vmem>>, vector<1x2x128xf32>,
    return
  }
  func.func @transform_0(%arg0: i32) -> (i32, i32) {
    %c0_i32 = arith.constant 0 : i32
    %c0_i32_0 = arith.constant 0 : i32
    return %arg0, %c0_i32 : i32, i32
  }
  func.func @transform_1(%arg0: i32) -> (i32, i32) {
    %c0_i32 = arith.constant 0 : i32
    %c0_i32_0 = arith.constant 0 : i32
    %c0_i32_1 = arith.constant 0 : i32
    return %c0_i32, %c0_i32_0 : i32, i32
  }
  func.func @transform_2(%arg0: i32) -> (i32, i32) {
    %c0_i32 = arith.constant 0 : i32
    %c0_i32_0 = arith.constant 0 : i32
    %c0_i32_1 = arith.constant 0 : i32
    return %c0_i32, %c0_i32_0 : i32, i32
  }
  func.func @transform_3(%arg0: i32) -> (i32, i32) {
    %c0_i32 = arith.constant 0 : i32
    %c0_i32_0 = arith.constant 0 : i32
    %c0_i32_1 = arith.constant 0 : i32
    return %c0_i32, %c0_i32_0 : i32, i32
  }
  func.func @transform_4(%arg0: i32) -> (i32, i32) {
    %c0_i32 = arith.constant 0 : i32
    %c0_i32_0 = arith.constant 0 : i32
    %c0_i32_1 = arith.constant 0 : i32
    return %c0_i32, %c0_i32_0 : i32, i32
  }
  func.func @transform_5(%arg0: i32) -> (i32, i32) {
    %c0_i32 = arith.constant 0 : i32
    %c0_i32_0 = arith.constant 0 : i32
    %c0_i32_1 = arith.constant 0 : i32
    return %c0_i32, %c0_i32_0 : i32, i32
  }
  func.func @transform_6(%arg0: i32) -> (i32, i32) {
    %c0_i32 = arith.constant 0 : i32
    %c0_i32_0 = arith.constant 0 : i32
    %c0_i32_1 = arith.constant 0 : i32
    return %c0_i32, %c0_i32_0 : i32, i32
  }
  func.func @transform_7(%arg0: i32) -> (i32, i32, i32) {
    %c0_i32 = arith.constant 0 : i32
    %c0_i32_0 = arith.constant 0 : i32
    %c0_i32_1 = arith.constant 0 : i32
    return %arg0, %c0_i32, %c0_i32_0 : i32, i32, i32
  }
}

</mosaic_0001>

<bundles_post_ra>
// kernel: tpu_custom_call.1
= control target key start
LH: loop header
LB: loop body
LE: loop exit
PB: predicated region body
PF: predicated region fallthrough
CT: control target
= control target key end

     0   :  { %12 = vsyncpa [#allocation3], 0  ;;  %s3559_s0 = inlined_call_operand.vmem [shape: f32[512,10], index: 0, kind: input, shape index: {}]   ;;  %s3560_s1 = inlined_call_operand.vmem [shape: bf16[10,512], index: 1, kind: input, shape index: {}]   ;;  %s3561_s2 = inlined_call_operand.vmem [shape: f32[1,256], index: 2, kind: input, shape index: {}]   ;;  %s3562_s3 = inlined_call_operand.vmem [shape: bf16[256,256], index: 3, kind: input, shape index: {}]   ;;  %s3563_s4 = inlined_call_operand.vmem [shape: f32[1,256], index: 4, kind: input, shape index: {}]   ;;  %s3564_s5 = inlined_call_operand.vmem [shape: bf16[256,128], index: 5, kind: input, shape index: {}]   ;;  %s3565_s6 = inlined_call_operand.vmem [shape: f32[1,128], index: 6, kind: input, shape index: {}]   ;;  %s3566_s7 = inlined_call_operand.hbm [shape: f32[2,2,128], index: 7, kind: output, shape index: {}]  }
   0x1   :  { %14 = vsyncpa [#allocation3 + $0x1], 0  ;;  %s2606_s24 = smov 0   ;;  %s2608_s25 = smov 0  }
   0x2   :  { %s2610_s26 = smov 0   ;;  %s2612_s27 = smov 0  }
   0x3 LB: > { %s2627_s28 = sadd.s32 4294967295, %s2564_s27   ;;  %s2120_s29 = sadd.s32 4294967294, %s2564_s27   ;;  %s2564_s27 = sphi %s2612_s27, %s3582_s27   ;;  %s2560_s26 = sphi %s2610_s26, %s3581_s26   ;;  %s2556_s25 = sphi %s2608_s25, %s3580_s25   ;;  %s2552_s24 = sphi %s2606_s24, %s3579_s24  }
   0x4   : > { %s2631_s30 = sadd.s32 1, %s2564_s27   ;;  %s179_s8 = sadd.s32 1, %s2560_s26 }
   0x5   : > { %s176_s9 = ssub.s32 %s2564_s27, %s2631_s30  ;;  %p189_p0 = scmp.ne.s32.totalorder %s2560_s26, %s2556_s25 }
   0x6   : > { %p177_p1 = scmp.eq.s32.totalorder %s176_s9, 0  ;;  %p190_p2 = scmp.eq.s32.totalorder %s2627_s28, 1 }
   0x7   : > { %p195_p3 = scmp.ne.s32.totalorder %s2556_s25, %s2552_s24  ;;  %p196_p4 = scmp.eq.s32.totalorder %s2120_s29, 1 }
   0x8   : > { %s2642_s10 = scalar_select %p177_p1, %s2560_s26, %s179_s8  }
   0x9   : > { %p2644_p5 = por %p190_p2, %p189_p0  ;;  %p2648_p6 = por %p196_p4, %p195_p3 }
   0xa   : > { %p2123_p7 = scmp.ge.s32.totalorder %s2564_s27, 1  ;;  %p241_p8 = scmp.lt.s32.totalorder %s2564_s27, 3 }
   0xc   : > { %p242_p9 = pnand %p2123_p7, %p241_p8 }
   0xe   : > { %245 = sbr.rel (%p242_p9) target bundleno = 1017 (0x3f9), region = 48 }
  0x13   : > { %v2129_v0 = vld [vmem:[%s3560_s1] sm:$0xf]  ;;  %v2406_v1 = vld [vmem:[%s3560_s1 + $0xc] sm:$0x10]  ;;  %vm397_vm0 = vcmask 1044480   ;;  %s2125_s17 = sshll.u32 %s2627_s28, 5 }
  0x14   : > { %v2130_v2 = vor.u32 %v2406_v1, %v2129_v0  ;;  %v2404_v3 = vld [vmem:[%s3560_s1 + $0x4] sm:$0xf]  ;;  %v2131_v4 = vld [vmem:[%s3560_s1 + $0x10] sm:$0x10]  ;;  %p274_p10 = scmp.lt.s32.totalorder %s2125_s17, 63  ;;  %vm348_vm1 = vcmask 80896  }
  0x15   : > { %v2134_v5 = vor.u32 %v2404_v3, %v2131_v4  ;;  %v2137_v6 = vld [vmem:[%s3560_s1 + $0x8] sm:$0xf]  ;;  %v2407_v7 = vld [vmem:[%s3560_s1 + $0x14] sm:$0x10]  ;;  %v2405_v8 = vld [vmem:[%s3560_s1 + $0xc] sm:$0xf] }
  0x16   : > { %v399_v9 = vsel %vm397_vm0, %v2130_v2, 0  ;;  %s3584_s17 = smov (!%p274_p10, %s2125_s17), 63  ;;  %v2138_v10 = vor.u32 %v2407_v7, %v2137_v6  ;;  %v2139_v11 = vld [vmem:[%s3560_s1 + $0x18] sm:$0x10]  ;;  %v2422_v40 = vld [vmem:[%s3562_s3 + $0x74] sm:$0xf] }
  0x17   : > { %2456 = vmatpush.bf16.msra.mxu2 %v399_v9  ;;  %v402_v12 = vsel %vm397_vm0, %v2134_v5, 0  ;;  %v2142_v13 = vor.u32 %v2405_v8, %v2139_v11  ;;  %417 = vmatpush.bf16.msra.mxu0 %v399_v9  ;;  %s2126_s16 = sshll.u32 %s3584_s17, 3  ;;  %v2267_v41 = vld [vmem:[%s3562_s3 + $0x78] sm:$0xf0]  ;;  %v2438_v43 = vld [vmem:[%s3562_s3 + $0xf4] sm:$0xf] }
  0x18   : > { %2457 = vmatpush.bf16.msra.mxu3 %v402_v12  ;;  %v405_v14 = vsel %vm397_vm0, %v2138_v10, 0  ;;  %506 = vmatpush.bf16.msra.mxu1 %v402_v12  ;;  %s2685_s20 = scalar_lea.vmem %s3559_s0, %s2126_s16  ;;  %v2270_v42 = vor.u32 %v2422_v40, %v2267_v41  ;;  %v2331_v44 = vld [vmem:[%s3562_s3 + $0xf8] sm:$0xf0]  ;;  %v2265_v52 = vld [vmem:[%s3562_s3 + $0x70] sm:$0xf]  ;;  %vm2023_vm2 = vcmask 1040384  }
  0x19   : > { %v408_v15 = vsel %vm397_vm0, %v2142_v13, 0  ;;  %v296_v16 = vld [vmem:[%s2685_s20 + $0x80] sm:$0xff]  ;;  %v297_v17 = vld [vmem:[%s2685_s20 + $0x88] sm:$0xff]  ;;  %v298_v19 = vld [vmem:[%s2685_s20 + $0x90] sm:$0xff]  ;;  %v2334_v45 = vor.u32 %v2438_v43, %v2331_v44  ;;  %s270_s29 = sand.u32 1, %s2556_s25   ;;  %s2522_s23 = scalar_lea.hbm %s3566_s7, 4 }
  0x1a   : > { %v2690_v18 = vpack.c.bf16 %v297_v17, %v296_v16  ;;  %v299_v20 = vld [vmem:[%s2685_s20 + $0x98] sm:$0xff]  ;;  %v300_v22 = vld [vmem:[%s2685_s20 + $0xa0] sm:$0xff]  ;;  %v301_v23 = vld [vmem:[%s2685_s20 + $0xa8] sm:$0xff]  ;;  %s2124_s8 = sshll.u32 %s270_s29, 1 }
  0x1b   : > { %595 = vmatpush.bf16.msrb.mxu2 %v405_v14  ;;  %v2698_v21 = vpack.c.bf16 %v299_v20, %v298_v19  ;;  %v2706_v24 = vpack.c.bf16 %v301_v23, %v300_v22  ;;  %v302_v25 = vld [vmem:[%s2685_s20 + $0xb0] sm:$0xff]  ;;  %v303_v26 = vld [vmem:[%s2685_s20 + $0xb8] sm:$0xff]  ;;  %v304_v28 = vld [vmem:[%s2685_s20 + $0xc0] sm:$0xff]  ;;  %s272_s15 = scalar_lea.vmem [#allocation2], %s2124_s8 }
  0x1c   : > { %684 = vmatpush.bf16.msrb.mxu3 %v408_v15  ;;  %2151 = vmatmul.msk.bf16.vlgmr.msra.gmra.mxu2 %vm348_vm1, %v2690_v18  ;;  %v2714_v27 = vpack.c.bf16 %v303_v26, %v302_v25  ;;  %v305_v29 = vld [vmem:[%s2685_s20 + $0xc8] sm:$0xff]  ;;  %v306_v31 = vld [vmem:[%s2685_s20 + $0xd0] sm:$0xff]  ;;  %v307_v32 = vld [vmem:[%s2685_s20 + $0xd8] sm:$0xff]  ;;  %s2058_s16 = sshll.u32 %s272_s15, 4  ;;  %s2059_s16 = int_to_ptr.vmem [resolvable:$true] %s2058_s16 }
  0x1d   : > { %2167 = vmatmul.msk.bf16.vlgmr.msra.gmra.mxu3 %vm348_vm1, %v2690_v18  ;;  %v2722_v30 = vpack.c.bf16 %v305_v29, %v304_v28  ;;  %v2730_v33 = vpack.c.bf16 %v307_v32, %v306_v31  ;;  %v280_v34 = vld [vmem:[%s2685_s20] sm:$0xff]  ;;  %v281_v35 = vld [vmem:[%s2685_s20 + $0x8] sm:$0xff]  ;;  %v310_v46 = vld [vmem:[%s2685_s20 + $0xf0] sm:$0xff] }
  0x1e   : > { %v312_v36 = vpack.c.bf16 %v281_v35, %v280_v34  ;;  %v308_v37 = vld [vmem:[%s2685_s20 + $0xe0] sm:$0xff]  ;;  %v309_v38 = vld [vmem:[%s2685_s20 + $0xe8] sm:$0xff]  ;;  %v311_v47 = vld [vmem:[%s2685_s20 + $0xf8] sm:$0xff] }
  0x1f   : > { %v2742_v39 = vpack.c.bf16 %v309_v38, %v308_v37  ;;  %1372 = vmatpush.bf16.msra.mxu2 %v2270_v42  ;;  %v282_v48 = vld [vmem:[%s2685_s20 + $0x10] sm:$0xff]  ;;  %v283_v49 = vld [vmem:[%s2685_s20 + $0x18] sm:$0xff]  ;;  %v2764_v50 = vpack.c.bf16 %v311_v47, %v310_v46  ;;  %v284_v58 = vld [vmem:[%s2685_s20 + $0x20] sm:$0xff] }
  0x20   : > { %2143 = vmatmul.msk.bf16.vlgmr.msra.gmra.mxu0 %vm348_vm1, %v312_v36  ;;  %2159 = vmatmul.msk.bf16.vlgmr.msra.gmra.mxu1 %vm348_vm1, %v312_v36  ;;  %v313_v51 = vpack.c.bf16 %v283_v49, %v282_v48  ;;  %v2423_v53 = vld [vmem:[%s3562_s3 + $0x74] sm:$0xf0]  ;;  %v2329_v54 = vld [vmem:[%s3562_s3 + $0xf0] sm:$0xf]  ;;  %v285_v59 = vld [vmem:[%s2685_s20 + $0x28] sm:$0xff] }
  0x21   : > { %1461 = vmatpush.bf16.msra.mxu3 %v2334_v45  ;;  %v2266_v55 = vor.u32 %v2423_v53, %v2265_v52  ;;  %v2439_v56 = vld [vmem:[%s3562_s3 + $0xf4] sm:$0xf0]  ;;  %v314_v60 = vpack.c.bf16 %v285_v59, %v284_v58  ;;  %v2420_v61 = vld [vmem:[%s3562_s3 + $0x64] sm:$0xf]  ;;  %v2259_v62 = vld [vmem:[%s3562_s3 + $0x68] sm:$0xf0] }
  0x22   : > { %v2330_v57 = vor.u32 %v2439_v56, %v2329_v54  ;;  %v2262_v63 = vor.u32 %v2420_v61, %v2259_v62  ;;  %v2257_v2 = vld [vmem:[%s3562_s3 + $0x60] sm:$0xf]  ;;  %v2421_v3 = vld [vmem:[%s3562_s3 + $0x64] sm:$0xf0]  ;;  %v2436_v4 = vld [vmem:[%s3562_s3 + $0xe4] sm:$0xf] }
  0x23   : > { %1194 = vmatpush.bf16.msrb.mxu0 %v2266_v55  ;;  %v2258_v5 = vor.u32 %v2421_v3, %v2257_v2  ;;  %v2323_v6 = vld [vmem:[%s3562_s3 + $0xe8] sm:$0xf0]  ;;  %v2321_v7 = vld [vmem:[%s3562_s3 + $0xe0] sm:$0xf]  ;;  %v2437_v8 = vld [vmem:[%s3562_s3 + $0xe4] sm:$0xf0] }
  0x24   : > { %1283 = vmatpush.bf16.msrb.mxu1 %v2330_v57  ;;  %1373 = vmatpush.bf16.msra.mxu2 %v2262_v63  ;;  %v2326_v9 = vor.u32 %v2436_v4, %v2323_v6  ;;  %v2322_v10 = vor.u32 %v2437_v8, %v2321_v7  ;;  %v286_v13 = vld [vmem:[%s2685_s20 + $0x30] sm:$0xff]  ;;  %v287_v14 = vld [vmem:[%s2685_s20 + $0x38] sm:$0xff]  ;;  %v288_v31 = vld [vmem:[%s2685_s20 + $0x40] sm:$0xff] }
  0x25   : > { %v315_v15 = vpack.c.bf16 %v287_v14, %v286_v13  ;;  %v2249_v19 = vld [vmem:[%s3562_s3 + $0x50] sm:$0xf]  ;;  %v2419_v20 = vld [vmem:[%s3562_s3 + $0x54] sm:$0xf0]  ;;  %v289_v32 = vld [vmem:[%s2685_s20 + $0x48] sm:$0xff] }
  0x26   : > { %1462 = vmatpush.bf16.msra.mxu3 %v2326_v9  ;;  %v2313_v22 = vld [vmem:[%s3562_s3 + $0xd0] sm:$0xf]  ;;  %v2250_v23 = vor.u32 %v2419_v20, %v2249_v19  ;;  %v2435_v25 = vld [vmem:[%s3562_s3 + $0xd4] sm:$0xf0]  ;;  %v316_v34 = vpack.c.bf16 %v289_v32, %v288_v31  ;;  %v2418_v35 = vld [vmem:[%s3562_s3 + $0x54] sm:$0xf] }
  0x27   : > { %1195 = vmatpush.bf16.msrb.mxu0 %v2258_v5  ;;  %v2314_v26 = vor.u32 %v2435_v25, %v2313_v22  ;;  %v2241_v41 = vld [vmem:[%s3562_s3 + $0x40] sm:$0xf]  ;;  %v2417_v42 = vld [vmem:[%s3562_s3 + $0x44] sm:$0xf0]  ;;  %v2434_v43 = vld [vmem:[%s3562_s3 + $0xd4] sm:$0xf] }
  0x28   : > { %1284 = vmatpush.bf16.msrb.mxu1 %v2322_v10  ;;  %v2242_v44 = vor.u32 %v2417_v42, %v2241_v41  ;;  %v2315_v45 = vld [vmem:[%s3562_s3 + $0xd8] sm:$0xf0]  ;;  %v2305_v46 = vld [vmem:[%s3562_s3 + $0xc0] sm:$0xf]  ;;  %v2433_v47 = vld [vmem:[%s3562_s3 + $0xc4] sm:$0xf0] }
  0x29   : > { %v2318_v48 = vor.u32 %v2434_v43, %v2315_v45  ;;  %v2306_v49 = vor.u32 %v2433_v47, %v2305_v46  ;;  %v290_v53 = vld [vmem:[%s2685_s20 + $0x50] sm:$0xff]  ;;  %v291_v54 = vld [vmem:[%s2685_s20 + $0x58] sm:$0xff]  ;;  %v292_v4 = vld [vmem:[%s2685_s20 + $0x60] sm:$0xff] }
  0x2a   : > { %v317_v55 = vpack.c.bf16 %v291_v54, %v290_v53  ;;  %v2233_v58 = vld [vmem:[%s3562_s3 + $0x30] sm:$0xf]  ;;  %v2415_v59 = vld [vmem:[%s3562_s3 + $0x34] sm:$0xf0]  ;;  %v293_v5 = vld [vmem:[%s2685_s20 + $0x68] sm:$0xff] }
  0x2b   : > { %1196 = vmatpush.bf16.msrb.mxu0 %v2250_v23  ;;  %1463 = vmatpush.bf16.msra.mxu3 %v2318_v48  ;;  %v2234_v61 = vor.u32 %v2415_v59, %v2233_v58  ;;  %v2431_v62 = vld [vmem:[%s3562_s3 + $0xb4] sm:$0xf0]  ;;  %v318_v6 = vpack.c.bf16 %v293_v5, %v292_v4  ;;  %v2416_v7 = vld [vmem:[%s3562_s3 + $0x44] sm:$0xf]  ;;  %v2243_v8 = vld [vmem:[%s3562_s3 + $0x48] sm:$0xf0] }
  0x2c   : > { %2152 = vmatmul.msk.bf16.gmra.mxu2 %vm348_vm1, %v2698_v21  ;;  %1285 = vmatpush.bf16.msrb.mxu1 %v2314_v26  ;;  %v2246_v9 = vor.u32 %v2416_v7, %v2243_v8  ;;  %v2225_v14 = vld [vmem:[%s3562_s3 + $0x20] sm:$0xf]  ;;  %v2432_v19 = vld [vmem:[%s3562_s3 + $0xc4] sm:$0xf]  ;;  %v2307_v22 = vld [vmem:[%s3562_s3 + $0xc8] sm:$0xf0] }
  0x2d   : > { %2168 = vmatmul.msk.bf16.gmra.mxu3 %vm348_vm1, %v2698_v21  ;;  %v2289_v23 = vld [vmem:[%s3562_s3 + $0xa0] sm:$0xf]  ;;  %v2429_v25 = vld [vmem:[%s3562_s3 + $0xa4] sm:$0xf0]  ;;  %v2310_v26 = vor.u32 %v2432_v19, %v2307_v22  ;;  %v2217_v43 = vld [vmem:[%s3562_s3 + $0x10] sm:$0xf] }
  0x2e   : > { %v2290_v31 = vor.u32 %v2429_v25, %v2289_v23  ;;  %v2281_v45 = vld [vmem:[%s3562_s3 + $0x90] sm:$0xf]  ;;  %v2427_v47 = vld [vmem:[%s3562_s3 + $0x94] sm:$0xf0]  ;;  %v2414_v54 = vld [vmem:[%s3562_s3 + $0x34] sm:$0xf] }
  0x2f   : > { %1197 = vmatpush.bf16.msrb.mxu0 %v2242_v44  ;;  %1464 = vmatpush.bf16.msra.mxu3 %v2310_v26  ;;  %v2411_v44 = vld [vmem:[%s3562_s3 + $0x14] sm:$0xf0]  ;;  %v2282_v48 = vor.u32 %v2427_v47, %v2281_v45  ;;  %v2409_v4 = vld [vmem:[%s3562_s3 + $0x4] sm:$0xf0]  ;;  %v2430_v5 = vld [vmem:[%s3562_s3 + $0xb4] sm:$0xf] }
  0x30   : > { %2144 = vmatmul.msk.bf16.gmra.mxu0 %vm348_vm1, %v313_v51  ;;  %2160 = vmatmul.msk.bf16.gmra.mxu1 %vm348_vm1, %v313_v51  ;;  %v2218_v46 = vor.u32 %v2411_v44, %v2217_v43  ;;  %v2299_v7 = vld [vmem:[%s3562_s3 + $0xb8] sm:$0xf0]  ;;  %v2273_v8 = vld [vmem:[%s3562_s3 + $0x80] sm:$0xf] }
  0x31   : > { %1286 = vmatpush.bf16.msrb.mxu1 %v2306_v49  ;;  %v2455_v43 = vld [vmem:[%s3564_s5 + $0x78] sm:$0xff] }
  0x33   : > { %1198 = vmatpush.bf16.msrb.mxu0 %v2234_v61 }
  0x3c   : > { %2153 = vmatmul.msk.bf16.gmra.mxu2 %vm348_vm1, %v2706_v24 }
  0x3d   : > { %2169 = vmatmul.msk.bf16.gmra.mxu3 %vm348_vm1, %v2706_v24 }
  0x40   : > { %2145 = vmatmul.msk.bf16.gmra.mxu0 %vm348_vm1, %v314_v60  ;;  %2161 = vmatmul.msk.bf16.gmra.mxu1 %vm348_vm1, %v314_v60 }
  0x4c   : > { %2154 = vmatmul.msk.bf16.gmra.mxu2 %vm348_vm1, %v2714_v27 }
  0x4d   : > { %2170 = vmatmul.msk.bf16.gmra.mxu3 %vm348_vm1, %v2714_v27 }
  0x50   : > { %2146 = vmatmul.msk.bf16.gmra.mxu0 %vm348_vm1, %v315_v15  ;;  %2162 = vmatmul.msk.bf16.gmra.mxu1 %vm348_vm1, %v315_v15 }
  0x5c   : > { %2155 = vmatmul.msk.bf16.gmra.mxu2 %vm348_vm1, %v2722_v30 }
  0x5d   : > { %2171 = vmatmul.msk.bf16.gmra.mxu3 %vm348_vm1, %v2722_v30 }
  0x60   : > { %2147 = vmatmul.msk.bf16.gmra.mxu0 %vm348_vm1, %v316_v34  ;;  %2163 = vmatmul.msk.bf16.gmra.mxu1 %vm348_vm1, %v316_v34 }
  0x6c   : > { %2156 = vmatmul.msk.bf16.gmra.mxu2 %vm348_vm1, %v2730_v33 }
  0x6d   : > { %2172 = vmatmul.msk.bf16.gmra.mxu3 %vm348_vm1, %v2730_v33 }
  0x70   : > { %2148 = vmatmul.msk.bf16.gmra.mxu0 %vm348_vm1, %v317_v55  ;;  %2164 = vmatmul.msk.bf16.gmra.mxu1 %vm348_vm1, %v317_v55 }
  0x7c   : > { %2157 = vmatmul.msk.bf16.gmra.mxu2 %vm348_vm1, %v2742_v39 }
  0x7d   : > { %2173 = vmatmul.msk.bf16.gmra.mxu3 %vm348_vm1, %v2742_v39 }
  0x80   : > { %2149 = vmatmul.msk.bf16.gmra.mxu0 %vm348_vm1, %v318_v6  ;;  %2165 = vmatmul.msk.bf16.gmra.mxu1 %vm348_vm1, %v318_v6 }
  0x8c   : > { %2158 = vmatmul.msk.bf16.gmra.mxu2 %vm348_vm1, %v2764_v50 }
  0x8d   : > { %2174 = vmatmul.msk.bf16.gmra.mxu3 %vm348_vm1, %v2764_v50 }
  0x9c   : > { %2175 = vmatmul.msk.bf16.vlgmr.msrb.gmra.mxu2 %vm348_vm1, %v312_v36 }
  0x9d   : > { %2191 = vmatmul.msk.bf16.vlgmr.msrb.gmra.mxu3 %vm348_vm1, %v312_v36  ;;  %v2251_v36 = vld [vmem:[%s3562_s3 + $0x58] sm:$0xf0]  ;;  %v419_v61 = vpop.f32.mrf.mxu0 }
  0x9e   : > { %v2254_v37 = vor.u32 %v2418_v35, %v2251_v36  ;;  %v294_v35 = vld [vmem:[%s2685_s20 + $0x70] sm:$0xff]  ;;  %v295_v36 = vld [vmem:[%s2685_s20 + $0x78] sm:$0xff]  ;;  %s2401_s20 = sshll.u32 %s2627_s28, 1  ;;  %s2046_s28 = scalar_lea.sflag [#allocation3], %s270_s29 }
  0x9f   : > { %v2796_v0 = vpop.f32.mrf.mxu2  ;;  %s2056_s14 = scalar_lea.hbm %s3566_s7, %s2401_s20 }
  0xa0   : > { %v2798_v1 = vpop.f32.mrf.mxu3  ;;  %1374 = vmatpush.bf16.msra.mxu2 %v2254_v37  ;;  %v319_v37 = vpack.c.bf16 %v295_v36, %v294_v35  ;;  %v2447_v36 = vld [vmem:[%s3564_s5 + $0x38] sm:$0xff]  ;;  %s2060_s18 = sshll.u32 %s2056_s14, 4  ;;  %s2061_s18 = int_to_ptr.hbm [resolvable:$true] %s2060_s18 }
  0xa1   : > { %s2516_s19 = sshra.s32 %s2061_s18, 4  ;;  %s2517_s19 = int_to_ptr.hbm [resolvable:$true] %s2516_s19 }
  0xa2   : > { %2150 = vmatmul.msk.bf16.gmra.mxu0 %vm348_vm1, %v319_v37  ;;  %2166 = vmatmul.msk.bf16.gmra.mxu1 %vm348_vm1, %v319_v37  ;;  %s2518_s17 = scalar_lea.hbm %s2517_s19, 2  ;;  %p2523_p0 = scmp.lt.s32.totalorder %s2517_s19, %s3566_s7 }
  0xa3   : > { %p2519_p11 = scmp.ne.s32.totalorder %s2517_s19, %s2518_s17  ;;  %p2524_p1 = scmp.lt.s32.totalorder %s2522_s23, %s2518_s17 }
  0xa4   : > { %1375 = vmatpush.bf16.msra.mxu2 %v2246_v9  ;;  %v2425_v9 = vld [vmem:[%s3562_s3 + $0x84] sm:$0xf0] }
  0xa5   : > { %v421_v22 = vpop.f32.mrf.mxu0  ;;  %p2520_p12 = pnand %p2519_p11, %p2644_p5  ;;  %p2525_p2 = por %p2524_p1, %p2523_p0 }
  0xa7   : > { %v2818_v11 = vpop.f32.mrf.mxu2  ;;  %p2521_p13 = pneg %p2520_p12 }
  0xa8   : > { %v2820_v12 = vpop.f32.mrf.mxu3 }
  0xa9   : > { %p2526_p3 = pnand %p2525_p2, %p2521_p13 }
  0xac   : > { %2176 = vmatmul.msk.bf16.gmra.mxu2 %vm348_vm1, %v313_v51 }
  0xad   : > { %2192 = vmatmul.msk.bf16.gmra.mxu3 %vm348_vm1, %v313_v51 }
  0xaf   : > { %v2828_v16 = vpop.f32.mrf.mxu2 }
  0xb0   : > { %v2830_v17 = vpop.f32.mrf.mxu3 }
  0xb7   : > { %v2844_v28 = vpop.f32.mrf.mxu2 }
  0xb8   : > { %v2846_v29 = vpop.f32.mrf.mxu3 }
  0xbc   : > { %2177 = vmatmul.msk.bf16.gmra.mxu2 %vm348_vm1, %v314_v60 }
  0xbd   : > { %2193 = vmatmul.msk.bf16.gmra.mxu3 %vm348_vm1, %v314_v60  ;;  %v2297_v60 = vld [vmem:[%s3562_s3 + $0xb0] sm:$0xf] }
  0xbe   : > { %v2298_v63 = vor.u32 %v2431_v62, %v2297_v60  ;;  %v508_v62 = vpop.f32.mrf.mxu1 }
  0xbf   : > { %v2860_v38 = vpop.f32.mrf.mxu2 }
  0xc0   : > { %v2862_v40 = vpop.f32.mrf.mxu3  ;;  %1287 = vmatpush.bf16.msrb.mxu1 %v2298_v63  ;;  %v2209_v63 = vld [vmem:[%s3562_s3] sm:$0xf] }
  0xc4   : > { %1288 = vmatpush.bf16.msrb.mxu1 %v2290_v31  ;;  %v424_v31 = vpop.f32.mrf.mxu0 }
  0xc6   : > { %v510_v23 = vpop.f32.mrf.mxu1 }
  0xc7   : > { %v2882_v51 = vpop.f32.mrf.mxu2 }
  0xc8   : > { %v2884_v52 = vpop.f32.mrf.mxu3  ;;  %1289 = vmatpush.bf16.msrb.mxu1 %v2282_v48 }
  0xcc   : > { %2178 = vmatmul.msk.bf16.gmra.mxu2 %vm348_vm1, %v315_v15  ;;  %v426_v48 = vpop.f32.mrf.mxu0 }
  0xcd   : > { %2194 = vmatmul.msk.bf16.gmra.mxu3 %vm348_vm1, %v315_v15  ;;  %v2413_v15 = vld [vmem:[%s3562_s3 + $0x24] sm:$0xf0] }
  0xce   : > { %v2226_v20 = vor.u32 %v2413_v15, %v2225_v14  ;;  %v2302_v14 = vor.u32 %v2430_v5, %v2299_v7  ;;  %v2274_v15 = vor.u32 %v2425_v9, %v2273_v8  ;;  %v513_v35 = vpop.f32.mrf.mxu1  ;;  %v2428_v7 = vld [vmem:[%s3562_s3 + $0xa4] sm:$0xf]  ;;  %v2291_v8 = vld [vmem:[%s3562_s3 + $0xa8] sm:$0xf0] }
  0xcf   : > { %v2892_v56 = vpop.f32.mrf.mxu2  ;;  %v2294_v9 = vor.u32 %v2428_v7, %v2291_v8 }
  0xd0   : > { %v2894_v57 = vpop.f32.mrf.mxu3  ;;  %1199 = vmatpush.bf16.msrb.mxu0 %v2226_v20  ;;  %1465 = vmatpush.bf16.msra.mxu3 %v2302_v14 }
  0xd1   : > { %1290 = vmatpush.bf16.msrb.mxu1 %v2274_v15 }
  0xd4   : > { %1200 = vmatpush.bf16.msrb.mxu0 %v2218_v46  ;;  %v2227_v46 = vld [vmem:[%s3562_s3 + $0x28] sm:$0xf0]  ;;  %1466 = vmatpush.bf16.msra.mxu3 %v2294_v9 }
  0xd5   : > { %1867 = vmatpush.bf16.msra.mxu1 %v2455_v43 }
  0xd7   : > { %v2908_v2 = vpop.f32.mrf.mxu2 }
  0xd8   : > { %v2910_v3 = vpop.f32.mrf.mxu3 }
  0xdc   : > { %2179 = vmatmul.msk.bf16.gmra.mxu2 %vm348_vm1, %v316_v34 }
  0xdd   : > { %2195 = vmatmul.msk.bf16.gmra.mxu3 %vm348_vm1, %v316_v34 }
  0xdf   : > { %v2924_v10 = vpop.f32.mrf.mxu2 }
  0xe0   : > { %v2926_v13 = vpop.f32.mrf.mxu3 }
  0xe7   : > { %v2946_v32 = vpop.f32.mrf.mxu2 }
  0xe8   : > { %v2948_v34 = vpop.f32.mrf.mxu3 }
  0xec   : > { %2180 = vmatmul.msk.bf16.gmra.mxu2 %vm348_vm1, %v317_v55 }
  0xed   : > { %2196 = vmatmul.msk.bf16.gmra.mxu3 %vm348_vm1, %v317_v55  ;;  %v2235_v55 = vld [vmem:[%s3562_s3 + $0x38] sm:$0xf0] }
  0xee   : > { %v2238_v58 = vor.u32 %v2414_v54, %v2235_v55  ;;  %v515_v54 = vpop.f32.mrf.mxu1 }
  0xef   : > { %v2956_v41 = vpop.f32.mrf.mxu2 }
  0xf0   : > { %v2958_v42 = vpop.f32.mrf.mxu3  ;;  %1376 = vmatpush.bf16.msra.mxu2 %v2238_v58 }
  0xf7   : > { %v2972_v49 = vpop.f32.mrf.mxu2 }
  0xf8   : > { %v2974_v53 = vpop.f32.mrf.mxu3 }
  0xfc   : > { %2181 = vmatmul.msk.bf16.gmra.mxu2 %vm348_vm1, %v318_v6 }
  0xfd   : > { %2197 = vmatmul.msk.bf16.gmra.mxu3 %vm348_vm1, %v318_v6  ;;  %v2210_v6 = vor.u32 %v2409_v4, %v2209_v63  ;;  %v830_v63 = vld [vmem:[%s3561_s2] sm:$0x3] }
  0xff   : > { %v2984_v59 = vpop.f32.mrf.mxu2  ;;  %1201 = vmatpush.bf16.msrb.mxu0 %v2210_v6  ;;  %v3041_v6 = vperm.slane %v830_v63, 1 }
 0x100   : > { %v2986_v60 = vpop.f32.mrf.mxu3 }
 0x103   : > { %1778 = vmatpush.bf16.msra.mxu0 %v2447_v36 }
 0x107   : > { %v3006_v19 = vpop.f32.mrf.mxu2 }
 0x108   : > { %v3008_v20 = vpop.f32.mrf.mxu3 }
 0x109   : > { %3569 = vst [vmem:[#allocation5_spill] sm:$0xff] %v3008_v20 }
 0x10c   : > { %2182 = vmatmul.msk.bf16.gmra.mxu2 %vm348_vm1, %v319_v37 }
 0x10d   : > { %2198 = vmatmul.msk.bf16.gmra.mxu3 %vm348_vm1, %v319_v37  ;;  %v2412_v37 = vld [vmem:[%s3562_s3 + $0x24] sm:$0xf] }
 0x10e   : > { %v2230_v47 = vor.u32 %v2412_v37, %v2227_v46  ;;  %v429_v37 = vpop.f32.mrf.mxu0  ;;  %v518_v46 = vpop.f32.mrf.mxu1 }
 0x10f   : > { %v3012_v25 = vpop.f32.mrf.mxu2 }
 0x110   : > { %3570 = vst [vmem:[#allocation6_spill] sm:$0xff] %v3012_v25  ;;  %v3014_v26 = vpop.f32.mrf.mxu3  ;;  %1377 = vmatpush.bf16.msra.mxu2 %v2230_v47 }
 0x111   : > { %3571 = vst [vmem:[#allocation7_spill] sm:$0xff] %v3014_v26 }
 0x116   : > { %v431_v7 = vpop.f32.mrf.mxu0  ;;  %v520_v8 = vpop.f32.mrf.mxu1 }
 0x117   : > { %v3022_v44 = vpop.f32.mrf.mxu2 }
 0x118   : > { %3572 = vst [vmem:[#allocation8_spill] sm:$0xff] %v3022_v44  ;;  %v3024_v45 = vpop.f32.mrf.mxu3 }
 0x119   : > { %3573 = vst [vmem:[#allocation9_spill] sm:$0xff] %v3024_v45 }
 0x11c   : > { %2183 = vmatmul.msk.bf16.gmra.mxu2 %vm348_vm1, %v2690_v18 }
 0x11d   : > { %2199 = vmatmul.msk.bf16.gmra.mxu3 %vm348_vm1, %v2690_v18  ;;  %v3039_v18 = vperm.slane %v830_v63, 0 }
 0x11f   : > { %v597_v55 = vpop.f32.mrf.mxu2 }
 0x120   : > { %v686_v58 = vpop.f32.mrf.mxu3  ;;  %v766_v4 = vmax.f32 %v419_v61, %v597_v55 }
 0x121   : > { %v767_v5 = vmax.f32 %v508_v62, %v686_v58 }
 0x122   : > { %v836_v36 = vadd.f32 %v3039_v18, %v766_v4 }
 0x123   : > { %v837_v61 = vadd.f32 %v3041_v6, %v767_v5 }
 0x124   : > { %v900_v58 = vmax.f32 %v836_v36, 0.0 }
 0x125   : > { %v901_v63 = vmax.f32 %v837_v61, 0.0 }
 0x127   : > { %v599_v14 = vpop.f32.mrf.mxu2 }
 0x128   : > { %v688_v15 = vpop.f32.mrf.mxu3  ;;  %v768_v43 = vmax.f32 %v421_v22, %v599_v14 }
 0x129   : > { %v769_v62 = vmax.f32 %v510_v23, %v688_v15  ;;  %v2446_v15 = vld [vmem:[%s3564_s5 + $0x30] sm:$0xff] }
 0x12a   : > { %v838_v47 = vadd.f32 %v3039_v18, %v768_v43  ;;  %1779 = vmatpush.bf16.msra.mxu0 %v2446_v15 }
 0x12b   : > { %v839_v55 = vadd.f32 %v3041_v6, %v769_v62 }
 0x12c   : > { %v902_v45 = vmax.f32 %v838_v47, 0.0  ;;  %2184 = vmatmul.msk.bf16.gmra.mxu2 %vm348_vm1, %v2698_v21 }
 0x12d   : > { %v903_v44 = vmax.f32 %v839_v55, 0.0  ;;  %2200 = vmatmul.msk.bf16.gmra.mxu3 %vm348_vm1, %v2698_v21  ;;  %v2454_v21 = vld [vmem:[%s3564_s5 + $0x70] sm:$0xff] }
 0x12e   : > { %v3057_v4 = vpack.c.bf16 %v902_v45, %v900_v58  ;;  %1868 = vmatpush.bf16.msra.mxu1 %v2454_v21 }
 0x12f   : > { %v3059_v22 = vpack.c.bf16 %v903_v44, %v901_v63  ;;  %v602_v23 = vpop.f32.mrf.mxu2 }
 0x130   : > { %v691_v5 = vpop.f32.mrf.mxu3  ;;  %1202 = vmatmul.bf16.vlgmr.msrb.gmra.mxu0 %v3057_v4  ;;  %v770_v9 = vmax.f32 %v424_v31, %v602_v23  ;;  %v434_v23 = vpop.f32.mrf.mxu0 }
 0x131   : > { %1291 = vmatmul.bf16.vlgmr.msrb.gmra.mxu1 %v3059_v22  ;;  %v771_v14 = vmax.f32 %v513_v35, %v691_v5  ;;  %v523_v5 = vpop.f32.mrf.mxu1 }
 0x132   : > { %v840_v44 = vadd.f32 %v3039_v18, %v770_v9 }
 0x133   : > { %v841_v45 = vadd.f32 %v3041_v6, %v771_v14 }
 0x134   : > { %v904_v47 = vmax.f32 %v840_v44, 0.0 }
 0x135   : > { %v905_v55 = vmax.f32 %v841_v45, 0.0 }
 0x137   : > { %v604_v36 = vpop.f32.mrf.mxu2 }
 0x138   : > { %v693_v61 = vpop.f32.mrf.mxu3  ;;  %v772_v43 = vmax.f32 %v426_v48, %v604_v36  ;;  %v2410_v48 = vld [vmem:[%s3562_s3 + $0x14] sm:$0xf] }
 0x139   : > { %v773_v62 = vmax.f32 %v515_v54, %v693_v61  ;;  %v2219_v54 = vld [vmem:[%s3562_s3 + $0x18] sm:$0xf0]  ;;  %v2426_v36 = vld [vmem:[%s3562_s3 + $0x94] sm:$0xf] }
 0x13a   : > { %v842_v31 = vadd.f32 %v3039_v18, %v772_v43  ;;  %v2222_v9 = vor.u32 %v2410_v48, %v2219_v54  ;;  %v2283_v61 = vld [vmem:[%s3562_s3 + $0x98] sm:$0xf0] }
 0x13b   : > { %v843_v35 = vadd.f32 %v3041_v6, %v773_v62  ;;  %v2286_v43 = vor.u32 %v2426_v36, %v2283_v61  ;;  %v436_v62 = vpop.f32.mrf.mxu0 }
 0x13c   : > { %2185 = vmatmul.msk.bf16.gmra.mxu2 %vm348_vm1, %v2706_v24  ;;  %v906_v58 = vmax.f32 %v842_v31, 0.0  ;;  %v525_v31 = vpop.f32.mrf.mxu1 }
 0x13d   : > { %2201 = vmatmul.msk.bf16.gmra.mxu3 %vm348_vm1, %v2706_v24  ;;  %v907_v63 = vmax.f32 %v843_v35, 0.0  ;;  %1378 = vmatpush.bf16.msra.mxu2 %v2222_v9 }
 0x13e   : > { %v3083_v14 = vpack.c.bf16 %v906_v58, %v904_v47  ;;  %1467 = vmatpush.bf16.msra.mxu3 %v2286_v43 }
 0x13f   : > { %v3085_v15 = vpack.c.bf16 %v907_v63, %v905_v55  ;;  %v607_v21 = vpop.f32.mrf.mxu2 }
 0x140   : > { %v696_v44 = vpop.f32.mrf.mxu3  ;;  %1207 = vmatmul.bf16.gmra.mxu0 %v3083_v14  ;;  %v774_v24 = vmax.f32 %v429_v37, %v607_v21 }
 0x141   : > { %1296 = vmatmul.bf16.gmra.mxu1 %v3085_v15  ;;  %v775_v45 = vmax.f32 %v518_v46, %v696_v44 }
 0x142   : > { %v844_v55 = vadd.f32 %v3039_v18, %v774_v24 }
 0x143   : > { %v845_v58 = vadd.f32 %v3041_v6, %v775_v45  ;;  %v439_v45 = vpop.f32.mrf.mxu0 }
 0x144   : > { %v908_v54 = vmax.f32 %v844_v55, 0.0  ;;  %v528_v61 = vpop.f32.mrf.mxu1 }
 0x145   : > { %v909_v9 = vmax.f32 %v845_v58, 0.0 }
 0x147   : > { %v609_v35 = vpop.f32.mrf.mxu2 }
 0x148   : > { %v698_v47 = vpop.f32.mrf.mxu3  ;;  %v776_v37 = vmax.f32 %v431_v7, %v609_v35 }
 0x149   : > { %v777_v46 = vmax.f32 %v520_v8, %v698_v47  ;;  %v2453_v47 = vld [vmem:[%s3564_s5 + $0x68] sm:$0xff] }
 0x14a   : > { %v846_v63 = vadd.f32 %v3039_v18, %v776_v37  ;;  %1869 = vmatpush.bf16.msra.mxu1 %v2453_v47 }
 0x14b   : > { %v847_v48 = vadd.f32 %v3041_v6, %v777_v46 }
 0x14c   : > { %2186 = vmatmul.msk.bf16.gmra.mxu2 %vm348_vm1, %v2714_v27  ;;  %v910_v21 = vmax.f32 %v846_v63, 0.0 }
 0x14d   : > { %2202 = vmatmul.msk.bf16.gmra.mxu3 %vm348_vm1, %v2714_v27  ;;  %v911_v44 = vmax.f32 %v847_v48, 0.0  ;;  %v2445_v27 = vld [vmem:[%s3564_s5 + $0x28] sm:$0xff] }
 0x14e   : > { %v3103_v36 = vpack.c.bf16 %v910_v21, %v908_v54  ;;  %1780 = vmatpush.bf16.msra.mxu0 %v2445_v27  ;;  %v441_v54 = vpop.f32.mrf.mxu0 }
 0x14f   : > { %v3105_v24 = vpack.c.bf16 %v911_v44, %v909_v9  ;;  %v612_v7 = vpop.f32.mrf.mxu2  ;;  %v530_v9 = vpop.f32.mrf.mxu1 }
 0x150   : > { %v701_v8 = vpop.f32.mrf.mxu3  ;;  %1212 = vmatmul.bf16.gmra.mxu0 %v3103_v36  ;;  %v778_v43 = vmax.f32 %v434_v23, %v612_v7 }
 0x151   : > { %1301 = vmatmul.bf16.gmra.mxu1 %v3105_v24  ;;  %v779_v35 = vmax.f32 %v523_v5, %v701_v8 }
 0x152   : > { %v848_v55 = vadd.f32 %v3039_v18, %v778_v43 }
 0x153   : > { %v849_v58 = vadd.f32 %v3041_v6, %v779_v35 }
 0x154   : > { %v912_v21 = vmax.f32 %v848_v55, 0.0 }
 0x155   : > { %v913_v44 = vmax.f32 %v849_v58, 0.0 }
 0x157   : > { %v614_v37 = vpop.f32.mrf.mxu2 }
 0x158   : > { %v703_v46 = vpop.f32.mrf.mxu3  ;;  %v780_v63 = vmax.f32 %v436_v62, %v614_v37  ;;  %v2408_v62 = vld [vmem:[%s3562_s3 + $0x4] sm:$0xf]  ;;  %v444_v37 = vpop.f32.mrf.mxu0 }
 0x159   : > { %v781_v48 = vmax.f32 %v525_v31, %v703_v46  ;;  %v2211_v31 = vld [vmem:[%s3562_s3 + $0x8] sm:$0xf0]  ;;  %v533_v46 = vpop.f32.mrf.mxu1 }
 0x15a   : > { %v850_v23 = vadd.f32 %v3039_v18, %v780_v63  ;;  %v2214_v43 = vor.u32 %v2408_v62, %v2211_v31  ;;  %v2424_v63 = vld [vmem:[%s3562_s3 + $0x84] sm:$0xf] }
 0x15b   : > { %v851_v5 = vadd.f32 %v3041_v6, %v781_v48  ;;  %v2275_v48 = vld [vmem:[%s3562_s3 + $0x88] sm:$0xf0] }
 0x15c   : > { %2187 = vmatmul.msk.bf16.gmra.mxu2 %vm348_vm1, %v2722_v30  ;;  %v914_v7 = vmax.f32 %v850_v23, 0.0  ;;  %v2278_v23 = vor.u32 %v2424_v63, %v2275_v48 }
 0x15d   : > { %2203 = vmatmul.msk.bf16.gmra.mxu3 %vm348_vm1, %v2722_v30  ;;  %v915_v8 = vmax.f32 %v851_v5, 0.0  ;;  %1379 = vmatpush.bf16.msra.mxu2 %v2214_v43 }
 0x15e   : > { %v3129_v35 = vpack.c.bf16 %v914_v7, %v912_v21  ;;  %1468 = vmatpush.bf16.msra.mxu3 %v2278_v23 }
 0x15f   : > { %v3131_v27 = vpack.c.bf16 %v915_v8, %v913_v44  ;;  %v617_v47 = vpop.f32.mrf.mxu2 }
 0x160   : > { %v706_v55 = vpop.f32.mrf.mxu3  ;;  %1217 = vmatmul.bf16.gmra.mxu0 %v3129_v35  ;;  %v782_v30 = vmax.f32 %v439_v45, %v617_v47  ;;  %v446_v63 = vpop.f32.mrf.mxu0 }
 0x161   : > { %1306 = vmatmul.bf16.gmra.mxu1 %v3131_v27  ;;  %v783_v58 = vmax.f32 %v528_v61, %v706_v55 }
 0x162   : > { %v852_v44 = vadd.f32 %v3039_v18, %v782_v30 }
 0x163   : > { %v853_v7 = vadd.f32 %v3041_v6, %v783_v58 }
 0x164   : > { %v916_v31 = vmax.f32 %v852_v44, 0.0 }
 0x165   : > { %v917_v43 = vmax.f32 %v853_v7, 0.0 }
 0x167   : > { %v619_v5 = vpop.f32.mrf.mxu2 }
 0x168   : > { %v708_v21 = vpop.f32.mrf.mxu3  ;;  %v784_v45 = vmax.f32 %v441_v54, %v619_v5  ;;  %v535_v54 = vpop.f32.mrf.mxu1 }
 0x169   : > { %v785_v61 = vmax.f32 %v530_v9, %v708_v21  ;;  %v2444_v21 = vld [vmem:[%s3564_s5 + $0x20] sm:$0xff] }
 0x16a   : > { %v854_v8 = vadd.f32 %v3039_v18, %v784_v45  ;;  %1781 = vmatpush.bf16.msra.mxu0 %v2444_v21 }
 0x16b   : > { %v855_v62 = vadd.f32 %v3041_v6, %v785_v61 }
 0x16c   : > { %v918_v47 = vmax.f32 %v854_v8, 0.0  ;;  %2188 = vmatmul.msk.bf16.gmra.mxu2 %vm348_vm1, %v2730_v33  ;;  %v449_v8 = vpop.f32.mrf.mxu0 }
 0x16d   : > { %v919_v55 = vmax.f32 %v855_v62, 0.0  ;;  %2204 = vmatmul.msk.bf16.gmra.mxu3 %vm348_vm1, %v2730_v33  ;;  %v2452_v33 = vld [vmem:[%s3564_s5 + $0x60] sm:$0xff] }
 0x16e   : > { %v3149_v30 = vpack.c.bf16 %v918_v47, %v916_v31  ;;  %1870 = vmatpush.bf16.msra.mxu1 %v2452_v33 }
 0x16f   : > { %v3151_v58 = vpack.c.bf16 %v919_v55, %v917_v43  ;;  %v622_v9 = vpop.f32.mrf.mxu2 }
 0x170   : > { %v711_v48 = vpop.f32.mrf.mxu3  ;;  %1222 = vmatmul.bf16.gmra.mxu0 %v3149_v30  ;;  %v786_v23 = vmax.f32 %v444_v37, %v622_v9 }
 0x171   : > { %1311 = vmatmul.bf16.gmra.mxu1 %v3151_v58  ;;  %v787_v5 = vmax.f32 %v533_v46, %v711_v48  ;;  %v538_v46 = vpop.f32.mrf.mxu1 }
 0x172   : > { %v856_v45 = vadd.f32 %v3039_v18, %v786_v23 }
 0x173   : > { %v857_v61 = vadd.f32 %v3041_v6, %v787_v5 }
 0x174   : > { %v920_v47 = vmax.f32 %v856_v45, 0.0  ;;  %v451_v21 = vpop.f32.mrf.mxu0 }
 0x175   : > { %v921_v55 = vmax.f32 %v857_v61, 0.0 }
 0x177   : > { %v624_v44 = vpop.f32.mrf.mxu2 }
 0x178   : > { %v713_v7 = vpop.f32.mrf.mxu3  ;;  %v788_v62 = vmax.f32 %v446_v63, %v624_v44 }
 0x179   : > { %v789_v37 = vmax.f32 %v535_v54, %v713_v7  ;;  %v540_v33 = vpop.f32.mrf.mxu1 }
 0x17a   : > { %v858_v31 = vadd.f32 %v3039_v18, %v788_v62 }
 0x17b   : > { %v859_v43 = vadd.f32 %v3041_v6, %v789_v37 }
 0x17c   : > { %v922_v9 = vmax.f32 %v858_v31, 0.0  ;;  %2189 = vmatmul.msk.bf16.gmra.mxu2 %vm348_vm1, %v2742_v39 }
 0x17d   : > { %v923_v48 = vmax.f32 %v859_v43, 0.0  ;;  %2205 = vmatmul.msk.bf16.gmra.mxu3 %vm348_vm1, %v2742_v39 }
 0x17e   : > { %v3169_v23 = vpack.c.bf16 %v922_v9, %v920_v47 }
 0x17f   : > { %v3171_v5 = vpack.c.bf16 %v923_v48, %v921_v55  ;;  %v627_v63 = vpop.f32.mrf.mxu2  ;;  %v454_v48 = vpop.f32.mrf.mxu0 }
 0x180   : > { %v716_v54 = vpop.f32.mrf.mxu3  ;;  %1227 = vmatmul.bf16.gmra.mxu0 %v3169_v23  ;;  %v790_v44 = vmax.f32 %v449_v8, %v627_v63 }
 0x181   : > { %1316 = vmatmul.bf16.gmra.mxu1 %v3171_v5  ;;  %v791_v7 = vmax.f32 %v538_v46, %v716_v54  ;;  %v543_v20 = vpop.f32.mrf.mxu1 }
 0x182   : > { %v860_v62 = vadd.f32 %v3039_v18, %v790_v44  ;;  %v2443_v44 = vld [vmem:[%s3564_s5 + $0x18] sm:$0xff] }
 0x183   : > { %v861_v39 = vadd.f32 %v3041_v6, %v791_v7  ;;  %1782 = vmatpush.bf16.msra.mxu0 %v2443_v44 }
 0x184   : > { %v924_v55 = vmax.f32 %v860_v62, 0.0 }
 0x185   : > { %v925_v9 = vmax.f32 %v861_v39, 0.0 }
 0x187   : > { %v629_v45 = vpop.f32.mrf.mxu2 }
 0x188   : > { %v718_v61 = vpop.f32.mrf.mxu3  ;;  %v792_v37 = vmax.f32 %v451_v21, %v629_v45 }
 0x189   : > { %v793_v31 = vmax.f32 %v540_v33, %v718_v61  ;;  %v545_v7 = vpop.f32.mrf.mxu1 }
 0x18a   : > { %v862_v43 = vadd.f32 %v3039_v18, %v792_v37 }
 0x18b   : > { %v863_v47 = vadd.f32 %v3041_v6, %v793_v31 }
 0x18c   : > { %v926_v26 = vmax.f32 %v862_v43, 0.0  ;;  %2190 = vmatmul.msk.bf16.gmra.mxu2 %vm348_vm1, %v2764_v50 }
 0x18d   : > { %v927_v25 = vmax.f32 %v863_v47, 0.0  ;;  %2206 = vmatmul.msk.bf16.gmra.mxu3 %vm348_vm1, %v2764_v50  ;;  %v2451_v50 = vld [vmem:[%s3564_s5 + $0x58] sm:$0xff] }
 0x18e   : > { %v3183_v8 = vpack.c.bf16 %v926_v26, %v924_v55  ;;  %v456_v26 = vpop.f32.mrf.mxu0  ;;  %1871 = vmatpush.bf16.msra.mxu1 %v2451_v50 }
 0x18f   : > { %v3185_v46 = vpack.c.bf16 %v927_v25, %v925_v9  ;;  %v632_v63 = vpop.f32.mrf.mxu2 }
 0x190   : > { %v721_v54 = vpop.f32.mrf.mxu3  ;;  %1232 = vmatmul.bf16.gmra.mxu0 %v3183_v8  ;;  %v794_v21 = vmax.f32 %v454_v48, %v632_v63 }
 0x191   : > { %1321 = vmatmul.bf16.gmra.mxu1 %v3185_v46  ;;  %v795_v33 = vmax.f32 %v543_v20, %v721_v54 }
 0x192   : > { %v864_v61 = vadd.f32 %v3039_v18, %v794_v21 }
 0x193   : > { %v865_v62 = vadd.f32 %v3041_v6, %v795_v33 }
 0x194   : > { %v928_v43 = vmax.f32 %v864_v61, 0.0 }
 0x195   : > { %v929_v47 = vmax.f32 %v865_v62, 0.0 }
 0x197   : > { %v634_v25 = vpop.f32.mrf.mxu2 }
 0x198   : > { %v723_v45 = vpop.f32.mrf.mxu3  ;;  %v796_v39 = vmax.f32 %v456_v26, %v634_v25 }
 0x199   : > { %v797_v20 = vmax.f32 %v545_v7, %v723_v45 }
 0x19a   : > { %v866_v37 = vadd.f32 %v3039_v18, %v796_v39 }
 0x19b   : > { %v867_v31 = vadd.f32 %v3041_v6, %v797_v20 }
 0x19c   : > { %v930_v55 = vmax.f32 %v866_v37, 0.0  ;;  %1380 = vmatmul.bf16.vlgmr.msra.gmra.mxu2 %v3057_v4  ;;  %v3212_v4 = vld [vmem:[%s3563_s4] sm:$0x3] }
 0x19d   : > { %v931_v9 = vmax.f32 %v867_v31, 0.0  ;;  %1469 = vmatmul.bf16.vlgmr.msra.gmra.mxu3 %v3059_v22 }
 0x19e   : > { %v3201_v48 = vpack.c.bf16 %v930_v55, %v928_v43 }
 0x19f   : > { %v3203_v63 = vpack.c.bf16 %v931_v9, %v929_v47  ;;  %v637_v54 = vpop.f32.mrf.mxu2 }
 0x1a0   : > { %v726_v21 = vpop.f32.mrf.mxu3  ;;  %1237 = vmatmul.bf16.gmra.mxu0 %v3201_v48  ;;  %v798_v33 = vmax.f32 %v2796_v0, %v637_v54 }
 0x1a1   : > { %1326 = vmatmul.bf16.gmra.mxu1 %v3203_v63  ;;  %v799_v44 = vmax.f32 %v2798_v1, %v726_v21  ;;  %v3221_v1 = vperm.slane %v3212_v4, 0 }
 0x1a2   : > { %v868_v22 = vadd.f32 %v3039_v18, %v798_v33  ;;  %v2450_v33 = vld [vmem:[%s3564_s5 + $0x50] sm:$0xff] }
 0x1a3   : > { %v869_v7 = vadd.f32 %v3041_v6, %v799_v44  ;;  %1872 = vmatpush.bf16.msra.mxu1 %v2450_v33 }
 0x1a4   : > { %v932_v62 = vmax.f32 %v868_v22, 0.0 }
 0x1a5   : > { %v933_v39 = vmax.f32 %v869_v7, 0.0 }
 0x1a7   : > { %v639_v50 = vpop.f32.mrf.mxu2 }
 0x1a8   : > { %v728_v26 = vpop.f32.mrf.mxu3  ;;  %v800_v25 = vmax.f32 %v2818_v11, %v639_v50 }
 0x1a9   : > { %v801_v45 = vmax.f32 %v2820_v12, %v728_v26 }
 0x1aa   : > { %v870_v61 = vadd.f32 %v3039_v18, %v800_v25 }
 0x1ab   : > { %v871_v0 = vadd.f32 %v3041_v6, %v801_v45 }
 0x1ac   : > { %v934_v20 = vmax.f32 %v870_v61, 0.0  ;;  %1385 = vmatmul.bf16.gmra.mxu2 %v3083_v14 }
 0x1ad   : > { %v935_v37 = vmax.f32 %v871_v0, 0.0  ;;  %1474 = vmatmul.bf16.gmra.mxu3 %v3085_v15  ;;  %v1203_v31 = vpop.f32.mrf.mxu0  ;;  %v2442_v15 = vld [vmem:[%s3564_s5 + $0x10] sm:$0xff] }
 0x1ae   : > { %v1292_v43 = vpop.f32.mrf.mxu1  ;;  %v1204_v11 = vadd.f32 %v1203_v31, %v3221_v1  ;;  %v3226_v12 = vpack.c.bf16 %v934_v20, %v932_v62  ;;  %1783 = vmatpush.bf16.msra.mxu0 %v2442_v15 }
 0x1af   : > { %v3228_v47 = vpack.c.bf16 %v935_v37, %v933_v39  ;;  %v642_v55 = vpop.f32.mrf.mxu2 }
 0x1b0   : > { %v731_v9 = vpop.f32.mrf.mxu3  ;;  %v1293_v54 = vadd.f32 %v1292_v43, %v1204_v11  ;;  %1242 = vmatmul.bf16.gmra.mxu0 %v3226_v12  ;;  %v802_v21 = vmax.f32 %v2828_v16, %v642_v55 }
 0x1b1   : > { %1331 = vmatmul.bf16.gmra.mxu1 %v3228_v47  ;;  %v803_v14 = vmax.f32 %v2830_v17, %v731_v9 }
 0x1b2   : > { %v872_v22 = vadd.f32 %v3039_v18, %v802_v21  ;;  %v1550_v0 = vmax.f32 %v1293_v54, 0.0 }
 0x1b3   : > { %v873_v17 = vadd.f32 %v3041_v6, %v803_v14 }
 0x1b4   : > { %v936_v37 = vmax.f32 %v872_v22, 0.0 }
 0x1b5   : > { %v1205_v44 = vpop.f32.mrf.mxu0  ;;  %v937_v31 = vmax.f32 %v873_v17, 0.0 }
 0x1b6   : > { %v1294_v50 = vpop.f32.mrf.mxu1  ;;  %v1206_v26 = vadd.f32 %v1205_v44, %v3221_v1 }
 0x1b7   : > { %v644_v7 = vpop.f32.mrf.mxu2 }
 0x1b8   : > { %v733_v16 = vpop.f32.mrf.mxu3  ;;  %v1295_v25 = vadd.f32 %v1294_v50, %v1206_v26  ;;  %v804_v45 = vmax.f32 %v2844_v28, %v644_v7 }
 0x1b9   : > { %v805_v61 = vmax.f32 %v2846_v29, %v733_v16 }
 0x1ba   : > { %v1552_v62 = vmax.f32 %v1295_v25, 0.0  ;;  %v874_v39 = vadd.f32 %v3039_v18, %v804_v45 }
 0x1bb   : > { %v875_v20 = vadd.f32 %v3041_v6, %v805_v61 }
 0x1bc   : > { %v3247_v43 = vpack.c.bf16 %v1552_v62, %v1550_v0  ;;  %v938_v11 = vmax.f32 %v874_v39, 0.0  ;;  %1390 = vmatmul.bf16.gmra.mxu2 %v3103_v36 }
 0x1bd   : > { %v939_v55 = vmax.f32 %v875_v20, 0.0  ;;  %1479 = vmatmul.bf16.gmra.mxu3 %v3105_v24  ;;  %v1208_v9 = vpop.f32.mrf.mxu0 }
 0x1be   : > { %v1297_v28 = vpop.f32.mrf.mxu1  ;;  %v1209_v29 = vadd.f32 %v1208_v9, %v3221_v1  ;;  %v3252_v54 = vpack.c.bf16 %v938_v11, %v936_v37 }
 0x1bf   : > { %v3254_v21 = vpack.c.bf16 %v939_v55, %v937_v31  ;;  %v647_v14 = vpop.f32.mrf.mxu2 }
 0x1c0   : > { %v736_v15 = vpop.f32.mrf.mxu3  ;;  %v1298_v33 = vadd.f32 %v1297_v28, %v1209_v29  ;;  %1247 = vmatmul.bf16.gmra.mxu0 %v3252_v54  ;;  %v806_v44 = vmax.f32 %v2860_v38, %v647_v14 }
 0x1c1   : > { %1336 = vmatmul.bf16.gmra.mxu1 %v3254_v21  ;;  %v807_v36 = vmax.f32 %v2862_v40, %v736_v15 }
 0x1c2   : > { %v876_v22 = vadd.f32 %v3039_v18, %v806_v44  ;;  %v1554_v0 = vmax.f32 %v1298_v33, 0.0  ;;  %v2441_v33 = vld [vmem:[%s3564_s5 + $0x8] sm:$0xff] }
 0x1c3   : > { %v877_v17 = vadd.f32 %v3041_v6, %v807_v36  ;;  %v2449_v44 = vld [vmem:[%s3564_s5 + $0x48] sm:$0xff]  ;;  %1784 = vmatpush.bf16.msra.mxu0 %v2441_v33 }
 0x1c4   : > { %v940_v39 = vmax.f32 %v876_v22, 0.0  ;;  %1873 = vmatpush.bf16.msra.mxu1 %v2449_v44 }
 0x1c5   : > { %v1210_v24 = vpop.f32.mrf.mxu0  ;;  %v941_v20 = vmax.f32 %v877_v17, 0.0 }
 0x1c6   : > { %v1299_v50 = vpop.f32.mrf.mxu1  ;;  %v1211_v26 = vadd.f32 %v1210_v24, %v3221_v1 }
 0x1c7   : > { %v649_v7 = vpop.f32.mrf.mxu2 }
 0x1c8   : > { %v738_v16 = vpop.f32.mrf.mxu3  ;;  %v1300_v25 = vadd.f32 %v1299_v50, %v1211_v26  ;;  %v808_v45 = vmax.f32 %v2882_v51, %v649_v7 }
 0x1c9   : > { %v809_v61 = vmax.f32 %v2884_v52, %v738_v16 }
 0x1ca   : > { %v1556_v62 = vmax.f32 %v1300_v25, 0.0  ;;  %v878_v38 = vadd.f32 %v3039_v18, %v808_v45 }
 0x1cb   : > { %v879_v40 = vadd.f32 %v3041_v6, %v809_v61 }
 0x1cc   : > { %v942_v37 = vmax.f32 %v878_v38, 0.0  ;;  %1395 = vmatmul.bf16.gmra.mxu2 %v3129_v35  ;;  %v3269_v11 = vpack.c.bf16 %v1556_v62, %v1554_v0 }
 0x1cd   : > { %v943_v31 = vmax.f32 %v879_v40, 0.0  ;;  %1484 = vmatmul.bf16.gmra.mxu3 %v3131_v27  ;;  %v1213_v55 = vpop.f32.mrf.mxu0 }
 0x1ce   : > { %v1302_v51 = vpop.f32.mrf.mxu1  ;;  %v1214_v52 = vadd.f32 %v1213_v55, %v3221_v1  ;;  %v3272_v9 = vpack.c.bf16 %v942_v37, %v940_v39 }
 0x1cf   : > { %v3274_v28 = vpack.c.bf16 %v943_v31, %v941_v20  ;;  %v652_v29 = vpop.f32.mrf.mxu2 }
 0x1d0   : > { %v741_v14 = vpop.f32.mrf.mxu3  ;;  %v1303_v15 = vadd.f32 %v1302_v51, %v1214_v52  ;;  %1252 = vmatmul.bf16.gmra.mxu0 %v3272_v9  ;;  %v810_v35 = vmax.f32 %v2892_v56, %v652_v29 }
 0x1d1   : > { %1341 = vmatmul.bf16.gmra.mxu1 %v3274_v28  ;;  %v811_v27 = vmax.f32 %v2894_v57, %v741_v14 }
 0x1d2   : > { %v880_v26 = vadd.f32 %v3039_v18, %v810_v35  ;;  %v1558_v25 = vmax.f32 %v1303_v15, 0.0 }
 0x1d3   : > { %v881_v57 = vadd.f32 %v3041_v6, %v811_v27 }
 0x1d4   : > { %v944_v62 = vmax.f32 %v880_v26, 0.0 }
 0x1d5   : > { %v1215_v36 = vpop.f32.mrf.mxu0  ;;  %v945_v38 = vmax.f32 %v881_v57, 0.0 }
 0x1d6   : > { %v1304_v24 = vpop.f32.mrf.mxu1  ;;  %v1216_v50 = vadd.f32 %v1215_v36, %v3221_v1 }
 0x1d7   : > { %v654_v22 = vpop.f32.mrf.mxu2 }
 0x1d8   : > { %v743_v56 = vpop.f32.mrf.mxu3  ;;  %v1305_v7 = vadd.f32 %v1304_v24, %v1216_v50  ;;  %v812_v16 = vmax.f32 %v2908_v2, %v654_v22 }
 0x1d9   : > { %v813_v17 = vmax.f32 %v2910_v3, %v743_v56 }
 0x1da   : > { %v1560_v45 = vmax.f32 %v1305_v7, 0.0  ;;  %v882_v61 = vadd.f32 %v3039_v18, %v812_v16 }
 0x1db   : > { %v883_v0 = vadd.f32 %v3041_v6, %v813_v17 }
 0x1dc   : > { %v946_v40 = vmax.f32 %v882_v61, 0.0  ;;  %1400 = vmatmul.bf16.gmra.mxu2 %v3149_v30  ;;  %v3295_v20 = vpack.c.bf16 %v1560_v45, %v1558_v25 }
 0x1dd   : > { %v947_v39 = vmax.f32 %v883_v0, 0.0  ;;  %1489 = vmatmul.bf16.gmra.mxu3 %v3151_v58  ;;  %v1218_v37 = vpop.f32.mrf.mxu0 }
 0x1de   : > { %v1307_v2 = vpop.f32.mrf.mxu1  ;;  %v1219_v3 = vadd.f32 %v1218_v37, %v3221_v1  ;;  %v3298_v31 = vpack.c.bf16 %v946_v40, %v944_v62  ;;  %v2448_v37 = vld [vmem:[%s3564_s5 + $0x40] sm:$0xff] }
 0x1df   : > { %v3300_v55 = vpack.c.bf16 %v947_v39, %v945_v38  ;;  %v657_v51 = vpop.f32.mrf.mxu2  ;;  %v2440_v39 = vld [vmem:[%s3564_s5] sm:$0xff]  ;;  %1874 = vmatpush.bf16.msra.mxu1 %v2448_v37 }
 0x1e0   : > { %v746_v52 = vpop.f32.mrf.mxu3  ;;  %v1308_v29 = vadd.f32 %v1307_v2, %v1219_v3  ;;  %1257 = vmatmul.bf16.gmra.mxu0 %v3298_v31  ;;  %v814_v30 = vmax.f32 %v2924_v10, %v657_v51 }
 0x1e1   : > { %1346 = vmatmul.bf16.gmra.mxu1 %v3300_v55  ;;  %v815_v58 = vmax.f32 %v2926_v13, %v746_v52  ;;  %1785 = vmatpush.bf16.msra.mxu0 %v2440_v39 }
 0x1e2   : > { %v884_v27 = vadd.f32 %v3039_v18, %v814_v30  ;;  %v1562_v22 = vmax.f32 %v1308_v29, 0.0 }
 0x1e3   : > { %v885_v36 = vadd.f32 %v3041_v6, %v815_v58 }
 0x1e4   : > { %v948_v57 = vmax.f32 %v884_v27, 0.0 }
 0x1e5   : > { %v1220_v14 = vpop.f32.mrf.mxu0  ;;  %v949_v7 = vmax.f32 %v885_v36, 0.0 }
 0x1e6   : > { %v1309_v15 = vpop.f32.mrf.mxu1  ;;  %v1221_v35 = vadd.f32 %v1220_v14, %v3221_v1 }
 0x1e7   : > { %v659_v33 = vpop.f32.mrf.mxu2 }
 0x1e8   : > { %v748_v44 = vpop.f32.mrf.mxu3  ;;  %v1310_v24 = vadd.f32 %v1309_v15, %v1221_v35  ;;  %v816_v50 = vmax.f32 %v2946_v32, %v659_v33 }
 0x1e9   : > { %v817_v26 = vmax.f32 %v2948_v34, %v748_v44 }
 0x1ea   : > { %v1564_v56 = vmax.f32 %v1310_v24, 0.0  ;;  %v886_v10 = vadd.f32 %v3039_v18, %v816_v50 }
 0x1eb   : > { %v887_v13 = vadd.f32 %v3041_v6, %v817_v26 }
 0x1ec   : > { %v950_v16 = vmax.f32 %v886_v10, 0.0  ;;  %1405 = vmatmul.bf16.gmra.mxu2 %v3169_v23  ;;  %v3315_v25 = vpack.c.bf16 %v1564_v56, %v1562_v22 }
 0x1ed   : > { %v951_v17 = vmax.f32 %v887_v13, 0.0  ;;  %1494 = vmatmul.bf16.gmra.mxu3 %v3171_v5  ;;  %v1223_v45 = vpop.f32.mrf.mxu0 }
 0x1ee   : > { %v1312_v32 = vpop.f32.mrf.mxu1  ;;  %v1224_v34 = vadd.f32 %v1223_v45, %v3221_v1  ;;  %v3318_v61 = vpack.c.bf16 %v950_v16, %v948_v57 }
 0x1ef   : > { %v3320_v0 = vpack.c.bf16 %v951_v17, %v949_v7  ;;  %v662_v62 = vpop.f32.mrf.mxu2 }
 0x1f0   : > { %v751_v38 = vpop.f32.mrf.mxu3  ;;  %v1313_v40 = vadd.f32 %v1312_v32, %v1224_v34  ;;  %1262 = vmatmul.bf16.gmra.mxu0 %v3318_v61  ;;  %v818_v23 = vmax.f32 %v2956_v41, %v662_v62 }
 0x1f1   : > { %1351 = vmatmul.bf16.gmra.mxu1 %v3320_v0  ;;  %v819_v5 = vmax.f32 %v2958_v42, %v751_v38 }
 0x1f2   : > { %v888_v52 = vadd.f32 %v3039_v18, %v818_v23  ;;  %v1566_v15 = vmax.f32 %v1313_v40, 0.0 }
 0x1f3   : > { %v889_v42 = vadd.f32 %v3041_v6, %v819_v5  ;;  %v3574_v5 = vld [vmem:[#allocation5_spill] sm:$0xff] }
 0x1f4   : > { %v952_v44 = vmax.f32 %v888_v52, 0.0 }
 0x1f5   : > { %v1225_v2 = vpop.f32.mrf.mxu0  ;;  %v953_v36 = vmax.f32 %v889_v42, 0.0 }
 0x1f6   : > { %v1314_v3 = vpop.f32.mrf.mxu1  ;;  %v1226_v51 = vadd.f32 %v1225_v2, %v3221_v1 }
 0x1f7   : > { %v664_v29 = vpop.f32.mrf.mxu2 }
 0x1f8   : > { %v753_v41 = vpop.f32.mrf.mxu3  ;;  %v1315_v30 = vadd.f32 %v1314_v3, %v1226_v51  ;;  %v820_v58 = vmax.f32 %v2972_v49, %v664_v29 }
 0x1f9   : > { %v821_v14 = vmax.f32 %v2974_v53, %v753_v41 }
 0x1fa   : > { %v1568_v35 = vmax.f32 %v1315_v30, 0.0  ;;  %v890_v27 = vadd.f32 %v3039_v18, %v820_v58 }
 0x1fb   : > { %v891_v33 = vadd.f32 %v3041_v6, %v821_v14 }
 0x1fc   : > { %v954_v24 = vmax.f32 %v890_v27, 0.0  ;;  %1410 = vmatmul.bf16.gmra.mxu2 %v3183_v8  ;;  %v3341_v26 = vpack.c.bf16 %v1568_v35, %v1566_v15 }
 0x1fd   : > { %v955_v50 = vmax.f32 %v891_v33, 0.0  ;;  %1499 = vmatmul.bf16.gmra.mxu3 %v3185_v46  ;;  %v1228_v22 = vpop.f32.mrf.mxu0 }
 0x1fe   : > { %v1317_v49 = vpop.f32.mrf.mxu1  ;;  %v1229_v53 = vadd.f32 %v1228_v22, %v3221_v1  ;;  %v3344_v56 = vpack.c.bf16 %v954_v24, %v952_v44 }
 0x1ff   : > { %v3346_v10 = vpack.c.bf16 %v955_v50, %v953_v36  ;;  %v667_v13 = vpop.f32.mrf.mxu2 }
 0x200   : > { %v756_v57 = vpop.f32.mrf.mxu3  ;;  %v1318_v7 = vadd.f32 %v1317_v49, %v1229_v53  ;;  %1267 = vmatmul.bf16.gmra.mxu0 %v3344_v56  ;;  %v822_v8 = vmax.f32 %v2984_v59, %v667_v13 }
 0x201   : > { %1356 = vmatmul.bf16.gmra.mxu1 %v3346_v10  ;;  %v823_v46 = vmax.f32 %v2986_v60, %v756_v57 }
 0x202   : > { %v892_v32 = vadd.f32 %v3039_v18, %v822_v8  ;;  %v1570_v37 = vmax.f32 %v1318_v7, 0.0  ;;  %v3577_v7 = vld [vmem:[#allocation8_spill] sm:$0xff] }
 0x203   : > { %v893_v38 = vadd.f32 %v3041_v6, %v823_v46  ;;  %v3578_v46 = vld [vmem:[#allocation9_spill] sm:$0xff] }
 0x204   : > { %v956_v3 = vmax.f32 %v892_v32, 0.0 }
 0x205   : > { %v1230_v16 = vpop.f32.mrf.mxu0  ;;  %v957_v51 = vmax.f32 %v893_v38, 0.0 }
 0x206   : > { %v1319_v17 = vpop.f32.mrf.mxu1  ;;  %v1231_v45 = vadd.f32 %v1230_v16, %v3221_v1 }
 0x207   : > { %v669_v34 = vpop.f32.mrf.mxu2 }
 0x208   : > { %v758_v62 = vpop.f32.mrf.mxu3  ;;  %v1320_v40 = vadd.f32 %v1319_v17, %v1231_v45  ;;  %v824_v23 = vmax.f32 %v3006_v19, %v669_v34 }
 0x209   : > { %v825_v39 = vmax.f32 %v3574_v5, %v758_v62 }
 0x20a   : > { %v1572_v2 = vmax.f32 %v1320_v40, 0.0  ;;  %v894_v59 = vadd.f32 %v3039_v18, %v824_v23 }
 0x20b   : > { %v895_v60 = vadd.f32 %v3041_v6, %v825_v39 }
 0x20c   : > { %v958_v52 = vmax.f32 %v894_v59, 0.0  ;;  %1415 = vmatmul.bf16.gmra.mxu2 %v3201_v48  ;;  %v3361_v41 = vpack.c.bf16 %v1572_v2, %v1570_v37  ;;  %v3575_v48 = vld [vmem:[#allocation6_spill] sm:$0xff] }
 0x20d   : > { %v959_v29 = vmax.f32 %v895_v60, 0.0  ;;  %1504 = vmatmul.bf16.gmra.mxu3 %v3203_v63  ;;  %v1233_v42 = vpop.f32.mrf.mxu0  ;;  %v3576_v63 = vld [vmem:[#allocation7_spill] sm:$0xff] }
 0x20e   : > { %v1322_v19 = vpop.f32.mrf.mxu1  ;;  %v1234_v30 = vadd.f32 %v1233_v42, %v3221_v1  ;;  %v3364_v58 = vpack.c.bf16 %v958_v52, %v956_v3 }
 0x20f   : > { %v3366_v14 = vpack.c.bf16 %v959_v29, %v957_v51  ;;  %v672_v15 = vpop.f32.mrf.mxu2  ;;  %v3389_v51 = vperm.slane %v3212_v4, 1 }
 0x210   : > { %v761_v35 = vpop.f32.mrf.mxu3  ;;  %v1323_v27 = vadd.f32 %v1322_v19, %v1234_v30  ;;  %1272 = vmatmul.bf16.gmra.mxu0 %v3364_v58  ;;  %v826_v33 = vmax.f32 %v3575_v48, %v672_v15 }
 0x211   : > { %1361 = vmatmul.bf16.gmra.mxu1 %v3366_v14  ;;  %v827_v44 = vmax.f32 %v3576_v63, %v761_v35 }
 0x212   : > { %v896_v22 = vadd.f32 %v3039_v18, %v826_v33  ;;  %v1574_v17 = vmax.f32 %v1323_v27, 0.0 }
 0x213   : > { %v897_v13 = vadd.f32 %v3041_v6, %v827_v44 }
 0x214   : > { %v960_v62 = vmax.f32 %v896_v22, 0.0 }
 0x215   : > { %v1235_v36 = vpop.f32.mrf.mxu0  ;;  %v961_v38 = vmax.f32 %v897_v13, 0.0 }
 0x216   : > { %v1324_v24 = vpop.f32.mrf.mxu1  ;;  %v1236_v50 = vadd.f32 %v1235_v36, %v3221_v1 }
 0x217   : > { %v674_v49 = vpop.f32.mrf.mxu2 }
 0x218   : > { %v763_v53 = vpop.f32.mrf.mxu3  ;;  %v1325_v57 = vadd.f32 %v1324_v24, %v1236_v50  ;;  %v828_v8 = vmax.f32 %v3577_v7, %v674_v49 }
 0x219   : > { %v829_v16 = vmax.f32 %v3578_v46, %v763_v53 }
 0x21a   : > { %v1576_v45 = vmax.f32 %v1325_v57, 0.0  ;;  %v898_v32 = vadd.f32 %v3039_v18, %v828_v8 }
 0x21b   : > { %v899_v34 = vadd.f32 %v3041_v6, %v829_v16 }
 0x21c   : > { %v962_v40 = vmax.f32 %v898_v32, 0.0  ;;  %1420 = vmatmul.bf16.gmra.mxu2 %v3226_v12  ;;  %v3381_v5 = vpack.c.bf16 %v1576_v45, %v1574_v17 }
 0x21d   : > { %v963_v23 = vmax.f32 %v899_v34, 0.0  ;;  %1509 = vmatmul.bf16.gmra.mxu3 %v3228_v47  ;;  %v1238_v39 = vpop.f32.mrf.mxu0 }
 0x21e   : > { %v1327_v37 = vpop.f32.mrf.mxu1  ;;  %v1239_v2 = vadd.f32 %v1238_v39, %v3221_v1  ;;  %v3384_v59 = vpack.c.bf16 %v962_v40, %v960_v62 }
 0x21f   : > { %v3386_v60 = vpack.c.bf16 %v963_v23, %v961_v38  ;;  %v1381_v18 = vpop.f32.mrf.mxu2 }
 0x220   : > { %v1470_v6 = vpop.f32.mrf.mxu3  ;;  %v1328_v3 = vadd.f32 %v1327_v37, %v1239_v2  ;;  %1277 = vmatmul.bf16.gmra.mxu0 %v3384_v59  ;;  %v1382_v12 = vadd.f32 %v1381_v18, %v3389_v51 }
 0x221   : > { %1366 = vmatmul.bf16.gmra.mxu1 %v3386_v60 }
 0x222   : > { %v1471_v30 = vadd.f32 %v1470_v6, %v1382_v12  ;;  %v1578_v27 = vmax.f32 %v1328_v3, 0.0 }
 0x224   : > { %v1551_v33 = vmax.f32 %v1471_v30, 0.0 }
 0x225   : > { %v1240_v47 = vpop.f32.mrf.mxu0 }
 0x226   : > { %v1329_v52 = vpop.f32.mrf.mxu1  ;;  %v1241_v29 = vadd.f32 %v1240_v47, %v3221_v1 }
 0x227   : > { %v1383_v42 = vpop.f32.mrf.mxu2 }
 0x228   : > { %v1472_v19 = vpop.f32.mrf.mxu3  ;;  %v1330_v15 = vadd.f32 %v1329_v52, %v1241_v29  ;;  %v1384_v35 = vadd.f32 %v1383_v42, %v3389_v51 }
 0x22a   : > { %v1580_v48 = vmax.f32 %v1330_v15, 0.0  ;;  %v1473_v4 = vadd.f32 %v1472_v19, %v1384_v35 }
 0x22c   : > { %v1553_v63 = vmax.f32 %v1473_v4, 0.0  ;;  %1425 = vmatmul.bf16.gmra.mxu2 %v3252_v54  ;;  %v3398_v44 = vpack.c.bf16 %v1580_v48, %v1578_v27 }
 0x22d   : > { %1514 = vmatmul.bf16.gmra.mxu3 %v3254_v21  ;;  %v1243_v36 = vpop.f32.mrf.mxu0 }
 0x22e   : > { %v1332_v24 = vpop.f32.mrf.mxu1  ;;  %v1615_v50 = vpack.c.bf16 %v1553_v63, %v1551_v33  ;;  %v1244_v22 = vadd.f32 %v1243_v36, %v3221_v1 }
 0x22f   : > { %v1386_v49 = vpop.f32.mrf.mxu2 }
 0x230   : > { %v1475_v53 = vpop.f32.mrf.mxu3  ;;  %v1333_v13 = vadd.f32 %v1332_v24, %v1244_v22  ;;  %1786 = vmatmul.bf16.vlgmr.msra.gmra.mxu0 %v3247_v43  ;;  %v1387_v57 = vadd.f32 %v1386_v49, %v3389_v51 }
 0x231   : > { %1875 = vmatmul.bf16.vlgmr.msra.gmra.mxu1 %v1615_v50 }
 0x232   : > { %v1476_v16 = vadd.f32 %v1475_v53, %v1387_v57  ;;  %v1582_v32 = vmax.f32 %v1333_v13, 0.0 }
 0x234   : > { %v1555_v38 = vmax.f32 %v1476_v16, 0.0 }
 0x235   : > { %v1245_v7 = vpop.f32.mrf.mxu0 }
 0x236   : > { %v1334_v8 = vpop.f32.mrf.mxu1  ;;  %v1246_v54 = vadd.f32 %v1245_v7, %v3221_v1 }
 0x237   : > { %v1388_v21 = vpop.f32.mrf.mxu2 }
 0x238   : > { %v1477_v46 = vpop.f32.mrf.mxu3  ;;  %v1335_v17 = vadd.f32 %v1334_v8, %v1246_v54  ;;  %v1389_v45 = vadd.f32 %v1388_v21, %v3389_v51 }
 0x23a   : > { %v1584_v34 = vmax.f32 %v1335_v17, 0.0  ;;  %v1478_v62 = vadd.f32 %v1477_v46, %v1389_v45 }
 0x23c   : > { %v1557_v40 = vmax.f32 %v1478_v62, 0.0  ;;  %1430 = vmatmul.bf16.gmra.mxu2 %v3272_v9  ;;  %v3407_v43 = vpack.c.bf16 %v1584_v34, %v1582_v32 }
 0x23d   : > { %1519 = vmatmul.bf16.gmra.mxu3 %v3274_v28  ;;  %v1248_v23 = vpop.f32.mrf.mxu0 }
 0x23e   : > { %v1337_v39 = vpop.f32.mrf.mxu1  ;;  %v1249_v37 = vadd.f32 %v1248_v23, %v3221_v1  ;;  %v1617_v2 = vpack.c.bf16 %v1557_v40, %v1555_v38 }
 0x23f   : > { %v1391_v18 = vpop.f32.mrf.mxu2 }
 0x240   : > { %v1480_v6 = vpop.f32.mrf.mxu3  ;;  %v1338_v3 = vadd.f32 %v1337_v39, %v1249_v37  ;;  %1791 = vmatmul.bf16.gmra.mxu0 %v3269_v11  ;;  %v1392_v12 = vadd.f32 %v1391_v18, %v3389_v51 }
 0x241   : > { %1880 = vmatmul.bf16.gmra.mxu1 %v1617_v2 }
 0x242   : > { %v1481_v42 = vadd.f32 %v1480_v6, %v1392_v12  ;;  %v1586_v15 = vmax.f32 %v1338_v3, 0.0 }
 0x244   : > { %v1559_v48 = vmax.f32 %v1481_v42, 0.0 }
 0x245   : > { %v1250_v47 = vpop.f32.mrf.mxu0 }
 0x246   : > { %v1339_v52 = vpop.f32.mrf.mxu1  ;;  %v1251_v9 = vadd.f32 %v1250_v47, %v3221_v1 }
 0x247   : > { %v1393_v28 = vpop.f32.mrf.mxu2 }
 0x248   : > { %v1482_v29 = vpop.f32.mrf.mxu3  ;;  %v1340_v19 = vadd.f32 %v1339_v52, %v1251_v9  ;;  %v1394_v30 = vadd.f32 %v1393_v28, %v3389_v51 }
 0x24a   : > { %v1588_v35 = vmax.f32 %v1340_v19, 0.0  ;;  %v1483_v27 = vadd.f32 %v1482_v29, %v1394_v30 }
 0x24c   : > { %v1561_v4 = vmax.f32 %v1483_v27, 0.0  ;;  %1435 = vmatmul.bf16.gmra.mxu2 %v3298_v31  ;;  %v3416_v11 = vpack.c.bf16 %v1588_v35, %v1586_v15 }
 0x24d   : > { %1524 = vmatmul.bf16.gmra.mxu3 %v3300_v55  ;;  %v1253_v33 = vpop.f32.mrf.mxu0 }
 0x24e   : > { %v1342_v63 = vpop.f32.mrf.mxu1  ;;  %v1254_v36 = vadd.f32 %v1253_v33, %v3221_v1  ;;  %v1619_v24 = vpack.c.bf16 %v1561_v4, %v1559_v48 }
 0x24f   : > { %v1396_v50 = vpop.f32.mrf.mxu2 }
 0x250   : > { %v1485_v22 = vpop.f32.mrf.mxu3  ;;  %v1343_v49 = vadd.f32 %v1342_v63, %v1254_v36  ;;  %1796 = vmatmul.bf16.gmra.mxu0 %v3295_v20  ;;  %v1397_v53 = vadd.f32 %v1396_v50, %v3389_v51 }
 0x251   : > { %1885 = vmatmul.bf16.gmra.mxu1 %v1619_v24 }
 0x252   : > { %v1486_v8 = vadd.f32 %v1485_v22, %v1397_v53  ;;  %v1590_v46 = vmax.f32 %v1343_v49, 0.0 }
 0x254   : > { %v1563_v45 = vmax.f32 %v1486_v8, 0.0 }
 0x255   : > { %v1255_v13 = vpop.f32.mrf.mxu0 }
 0x256   : > { %v1344_v57 = vpop.f32.mrf.mxu1  ;;  %v1256_v31 = vadd.f32 %v1255_v13, %v3221_v1 }
 0x257   : > { %v1398_v55 = vpop.f32.mrf.mxu2 }
 0x258   : > { %v1487_v7 = vpop.f32.mrf.mxu3  ;;  %v1345_v54 = vadd.f32 %v1344_v57, %v1256_v31  ;;  %v1399_v21 = vadd.f32 %v1398_v55, %v3389_v51 }
 0x25a   : > { %v1592_v16 = vmax.f32 %v1345_v54, 0.0  ;;  %v1488_v17 = vadd.f32 %v1487_v7, %v1399_v21 }
 0x25c   : > { %v1565_v32 = vmax.f32 %v1488_v17, 0.0  ;;  %1440 = vmatmul.bf16.gmra.mxu2 %v3318_v61  ;;  %v3425_v20 = vpack.c.bf16 %v1592_v16, %v1590_v46 }
 0x25d   : > { %1529 = vmatmul.bf16.gmra.mxu3 %v3320_v0  ;;  %v1258_v34 = vpop.f32.mrf.mxu0 }
 0x25e   : > { %v1347_v62 = vpop.f32.mrf.mxu1  ;;  %v1259_v38 = vadd.f32 %v1258_v34, %v3221_v1  ;;  %v1621_v40 = vpack.c.bf16 %v1565_v32, %v1563_v45 }
 0x25f   : > { %v1401_v23 = vpop.f32.mrf.mxu2 }
 0x260   : > { %v1490_v39 = vpop.f32.mrf.mxu3  ;;  %v1348_v37 = vadd.f32 %v1347_v62, %v1259_v38  ;;  %1801 = vmatmul.bf16.gmra.mxu0 %v3315_v25  ;;  %v1402_v2 = vadd.f32 %v1401_v23, %v3389_v51 }
 0x261   : > { %1890 = vmatmul.bf16.gmra.mxu1 %v1621_v40 }
 0x262   : > { %v1491_v12 = vadd.f32 %v1490_v39, %v1402_v2  ;;  %v1594_v9 = vmax.f32 %v1348_v37, 0.0 }
 0x264   : > { %v1567_v42 = vmax.f32 %v1491_v12, 0.0 }
 0x265   : > { %v1260_v18 = vpop.f32.mrf.mxu0 }
 0x266   : > { %v1349_v6 = vpop.f32.mrf.mxu1  ;;  %v1261_v61 = vadd.f32 %v1260_v18, %v3221_v1 }
 0x267   : > { %v1403_v0 = vpop.f32.mrf.mxu2 }
 0x268   : > { %v1492_v3 = vpop.f32.mrf.mxu3  ;;  %v1350_v47 = vadd.f32 %v1349_v6, %v1261_v61  ;;  %v1404_v52 = vadd.f32 %v1403_v0, %v3389_v51 }
 0x26a   : > { %v1596_v28 = vmax.f32 %v1350_v47, 0.0  ;;  %v1493_v29 = vadd.f32 %v1492_v3, %v1404_v52 }
 0x26c   : > { %v1569_v19 = vmax.f32 %v1493_v29, 0.0  ;;  %1445 = vmatmul.bf16.gmra.mxu2 %v3344_v56  ;;  %v3434_v25 = vpack.c.bf16 %v1596_v28, %v1594_v9 }
 0x26d   : > { %1534 = vmatmul.bf16.gmra.mxu3 %v3346_v10  ;;  %v1263_v30 = vpop.f32.mrf.mxu0 }
 0x26e   : > { %v1352_v15 = vpop.f32.mrf.mxu1  ;;  %v1623_v35 = vpack.c.bf16 %v1569_v19, %v1567_v42  ;;  %v1264_v27 = vadd.f32 %v1263_v30, %v3221_v1 }
 0x26f   : > { %v1406_v48 = vpop.f32.mrf.mxu2 }
 0x270   : > { %v1495_v4 = vpop.f32.mrf.mxu3  ;;  %v1353_v33 = vadd.f32 %v1352_v15, %v1264_v27  ;;  %1806 = vmatmul.bf16.gmra.mxu0 %v3341_v26  ;;  %v1407_v63 = vadd.f32 %v1406_v48, %v3389_v51 }
 0x271   : > { %1895 = vmatmul.bf16.gmra.mxu1 %v1623_v35 }
 0x272   : > { %v1496_v22 = vadd.f32 %v1495_v4, %v1407_v63  ;;  %v1598_v13 = vmax.f32 %v1353_v33, 0.0 }
 0x274   : > { %v1571_v55 = vmax.f32 %v1496_v22, 0.0 }
 0x275   : > { %v1265_v36 = vpop.f32.mrf.mxu0 }
 0x276   : > { %v1354_v24 = vpop.f32.mrf.mxu1  ;;  %v1266_v56 = vadd.f32 %v1265_v36, %v3221_v1 }
 0x277   : > { %v1408_v10 = vpop.f32.mrf.mxu2 }
 0x278   : > { %v1497_v50 = vpop.f32.mrf.mxu3  ;;  %v1355_v49 = vadd.f32 %v1354_v24, %v1266_v56  ;;  %v1409_v53 = vadd.f32 %v1408_v10, %v3389_v51 }
 0x27a   : > { %v1600_v57 = vmax.f32 %v1355_v49, 0.0  ;;  %v1498_v31 = vadd.f32 %v1497_v50, %v1409_v53 }
 0x27c   : > { %v1573_v7 = vmax.f32 %v1498_v31, 0.0  ;;  %1450 = vmatmul.bf16.gmra.mxu2 %v3364_v58  ;;  %v3443_v26 = vpack.c.bf16 %v1600_v57, %v1598_v13 }
 0x27d   : > { %1539 = vmatmul.bf16.gmra.mxu3 %v3366_v14  ;;  %v1268_v8 = vpop.f32.mrf.mxu0 }
 0x27e   : > { %v1357_v54 = vpop.f32.mrf.mxu1  ;;  %v1625_v21 = vpack.c.bf16 %v1573_v7, %v1571_v55  ;;  %v1269_v46 = vadd.f32 %v1268_v8, %v3221_v1 }
 0x27f   : > { %v1411_v16 = vpop.f32.mrf.mxu2 }
 0x280   : > { %v1500_v17 = vpop.f32.mrf.mxu3  ;;  %v1358_v45 = vadd.f32 %v1357_v54, %v1269_v46  ;;  %1811 = vmatmul.bf16.gmra.mxu0 %v3361_v41  ;;  %v1412_v32 = vadd.f32 %v1411_v16, %v3389_v51 }
 0x281   : > { %1900 = vmatmul.bf16.gmra.mxu1 %v1625_v21 }
 0x282   : > { %v1501_v40 = vadd.f32 %v1500_v17, %v1412_v32  ;;  %v1602_v37 = vmax.f32 %v1358_v45, 0.0 }
 0x284   : > { %v1575_v6 = vmax.f32 %v1501_v40, 0.0 }
 0x285   : > { %v1270_v34 = vpop.f32.mrf.mxu0 }
 0x286   : > { %v1359_v62 = vpop.f32.mrf.mxu1  ;;  %v1271_v58 = vadd.f32 %v1270_v34, %v3221_v1 }
 0x287   : > { %v1413_v14 = vpop.f32.mrf.mxu2 }
 0x288   : > { %v1502_v38 = vpop.f32.mrf.mxu3  ;;  %v1360_v23 = vadd.f32 %v1359_v62, %v1271_v58  ;;  %v1414_v39 = vadd.f32 %v1413_v14, %v3389_v51 }
 0x28a   : > { %v1604_v2 = vmax.f32 %v1360_v23, 0.0  ;;  %v1503_v18 = vadd.f32 %v1502_v38, %v1414_v39 }
 0x28c   : > { %v1577_v61 = vmax.f32 %v1503_v18, 0.0  ;;  %1455 = vmatmul.bf16.gmra.mxu2 %v3384_v59  ;;  %v3452_v41 = vpack.c.bf16 %v1604_v2, %v1602_v37 }
 0x28d   : > { %1544 = vmatmul.bf16.gmra.mxu3 %v3386_v60  ;;  %v1273_v0 = vpop.f32.mrf.mxu0 }
 0x28e   : > { %v1362_v3 = vpop.f32.mrf.mxu1  ;;  %v1627_v12 = vpack.c.bf16 %v1577_v61, %v1575_v6  ;;  %v1274_v47 = vadd.f32 %v1273_v0, %v3221_v1 }
 0x28f   : > { %v1416_v52 = vpop.f32.mrf.mxu2 }
 0x290   : > { %v1505_v9 = vpop.f32.mrf.mxu3  ;;  %v1363_v28 = vadd.f32 %v1362_v3, %v1274_v47  ;;  %1816 = vmatmul.bf16.gmra.mxu0 %v3381_v5  ;;  %v1417_v29 = vadd.f32 %v1416_v52, %v3389_v51 }
 0x291   : > { %1905 = vmatmul.bf16.gmra.mxu1 %v1627_v12 }
 0x292   : > { %v1506_v15 = vadd.f32 %v1505_v9, %v1417_v29  ;;  %v1606_v48 = vmax.f32 %v1363_v28, 0.0 }
 0x294   : > { %v1579_v63 = vmax.f32 %v1506_v15, 0.0 }
 0x295   : > { %v1275_v42 = vpop.f32.mrf.mxu0 }
 0x296   : > { %v1364_v19 = vpop.f32.mrf.mxu1  ;;  %v1276_v59 = vadd.f32 %v1275_v42, %v3221_v1 }
 0x297   : > { %v1418_v60 = vpop.f32.mrf.mxu2 }
 0x298   : > { %v1507_v30 = vpop.f32.mrf.mxu3  ;;  %v1365_v35 = vadd.f32 %v1364_v19, %v1276_v59  ;;  %v1419_v27 = vadd.f32 %v1418_v60, %v3389_v51 }
 0x29a   : > { %v1608_v4 = vmax.f32 %v1365_v35, 0.0  ;;  %v1508_v33 = vadd.f32 %v1507_v30, %v1419_v27 }
 0x29c   : > { %v1581_v36 = vmax.f32 %v1508_v33, 0.0  ;;  %v3459_v24 = vpack.c.bf16 %v1608_v4, %v1606_v48 }
 0x29d   : > { %v1278_v5 = vpop.f32.mrf.mxu0 }
 0x29e   : > { %v1367_v56 = vpop.f32.mrf.mxu1  ;;  %v1629_v10 = vpack.c.bf16 %v1581_v36, %v1579_v63  ;;  %v1279_v50 = vadd.f32 %v1278_v5, %v3221_v1 }
 0x29f   : > { %v1421_v22 = vpop.f32.mrf.mxu2 }
 0x2a0   : > { %v1510_v49 = vpop.f32.mrf.mxu3  ;;  %v1368_v53 = vadd.f32 %v1367_v56, %v1279_v50  ;;  %1821 = vmatmul.bf16.gmra.mxu0 %v3398_v44  ;;  %v1422_v13 = vadd.f32 %v1421_v22, %v3389_v51  ;;  %v3469_v44 = vld [vmem:[%s3565_s6] ss:$0 sm:$0xff] }
 0x2a1   : > { %1910 = vmatmul.bf16.gmra.mxu1 %v1629_v10 }
 0x2a2   : > { %v1511_v54 = vadd.f32 %v1510_v49, %v1422_v13  ;;  %v1610_v16 = vmax.f32 %v1368_v53, 0.0 }
 0x2a4   : > { %v1583_v32 = vmax.f32 %v1511_v54, 0.0 }
 0x2a5   : > { %v1280_v57 = vpop.f32.mrf.mxu0 }
 0x2a6   : > { %v1369_v31 = vpop.f32.mrf.mxu1  ;;  %v1281_v55 = vadd.f32 %v1280_v57, %v3221_v1 }
 0x2a7   : > { %v1423_v7 = vpop.f32.mrf.mxu2 }
 0x2a8   : > { %v1512_v8 = vpop.f32.mrf.mxu3  ;;  %v1370_v21 = vadd.f32 %v1369_v31, %v1281_v55  ;;  %v1424_v46 = vadd.f32 %v1423_v7, %v3389_v51 }
 0x2aa   : > { %v1612_v17 = vmax.f32 %v1370_v21, 0.0  ;;  %v1513_v45 = vadd.f32 %v1512_v8, %v1424_v46 }
 0x2ac   : > { %v1585_v34 = vmax.f32 %v1513_v45, 0.0  ;;  %v3471_v62 = vpack.c.bf16 %v1612_v17, %v1610_v16 }
 0x2ad   : > { %v1787_v58 = vpop.f32.mrf.mxu0 }
 0x2ae   : > { %v1876_v1 = vpop.f32.mrf.mxu1  ;;  %v1631_v14 = vpack.c.bf16 %v1585_v34, %v1583_v32  ;;  %v1788_v38 = vadd.f32 %v3469_v44, %v1787_v58 }
 0x2af   : > { %v1426_v40 = vpop.f32.mrf.mxu2 }
 0x2b0   : > { %v1515_v23 = vpop.f32.mrf.mxu3  ;;  %1826 = vmatmul.bf16.gmra.mxu0 %v3407_v43  ;;  %v1877_v39 = vadd.f32 %v1876_v1, %v1788_v38  ;;  %v1427_v37 = vadd.f32 %v1426_v40, %v3389_v51 }
 0x2b1   : > { %1915 = vmatmul.bf16.gmra.mxu1 %v1631_v14 }
 0x2b2   : > { %1956 = vxpose.xlu0.b32.start [1/16] (narrow) %v1877_v39, 8  ;;  %v1516_v3 = vadd.f32 %v1515_v23, %v1427_v37 }
 0x2b4   : > { %v1587_v9 = vmax.f32 %v1516_v3, 0.0 }
 0x2b5   : > { %v1789_v2 = vpop.f32.mrf.mxu0 }
 0x2b6   : > { %v1878_v18 = vpop.f32.mrf.mxu1  ;;  %v1790_v6 = vadd.f32 %v3469_v44, %v1789_v2 }
 0x2b7   : > { %v1428_v61 = vpop.f32.mrf.mxu2 }
 0x2b8   : > { %v1517_v0 = vpop.f32.mrf.mxu3  ;;  %v1429_v12 = vadd.f32 %v1428_v61, %v3389_v51  ;;  %v1879_v47 = vadd.f32 %v1878_v18, %v1790_v6 }
 0x2ba   : > { %v1518_v52 = vadd.f32 %v1517_v0, %v1429_v12  ;;  %1957 = vxpose.xlu0.b32.cont [2/16] (narrow) %v1879_v47, 8 }
 0x2bc   : > { %v1589_v28 = vmax.f32 %v1518_v52, 0.0 }
 0x2bd   : > { %v1792_v43 = vpop.f32.mrf.mxu0 }
 0x2be   : > { %v1881_v29 = vpop.f32.mrf.mxu1  ;;  %v1633_v42 = vpack.c.bf16 %v1589_v28, %v1587_v9  ;;  %v1793_v19 = vadd.f32 %v3469_v44, %v1792_v43 }
 0x2bf   : > { %v1431_v59 = vpop.f32.mrf.mxu2 }
 0x2c0   : > { %v1520_v60 = vpop.f32.mrf.mxu3  ;;  %v1882_v30 = vadd.f32 %v1881_v29, %v1793_v19  ;;  %1831 = vmatmul.bf16.gmra.mxu0 %v3416_v11  ;;  %v1432_v15 = vadd.f32 %v1431_v59, %v3389_v51 }
 0x2c1   : > { %1920 = vmatmul.bf16.gmra.mxu1 %v1633_v42 }
 0x2c2   : > { %1958 = vxpose.xlu0.b32.cont [3/16] (narrow) %v1882_v30, 8  ;;  %v1521_v63 = vadd.f32 %v1520_v60, %v1432_v15 }
 0x2c4   : > { %v1591_v10 = vmax.f32 %v1521_v63, 0.0 }
 0x2c5   : > { %v1794_v35 = vpop.f32.mrf.mxu0 }
 0x2c6   : > { %v1883_v27 = vpop.f32.mrf.mxu1  ;;  %v1795_v48 = vadd.f32 %v3469_v44, %v1794_v35 }
 0x2c7   : > { %v1433_v4 = vpop.f32.mrf.mxu2 }
 0x2c8   : > { %v1522_v33 = vpop.f32.mrf.mxu3  ;;  %v1434_v36 = vadd.f32 %v1433_v4, %v3389_v51  ;;  %v1884_v5 = vadd.f32 %v1883_v27, %v1795_v48 }
 0x2ca   : > { %v1523_v56 = vadd.f32 %v1522_v33, %v1434_v36  ;;  %1959 = vxpose.xlu0.b32.cont [4/16] (narrow) %v1884_v5, 8 }
 0x2cc   : > { %v1593_v50 = vmax.f32 %v1523_v56, 0.0 }
 0x2cd   : > { %v1797_v22 = vpop.f32.mrf.mxu0 }
 0x2ce   : > { %v1886_v11 = vpop.f32.mrf.mxu1  ;;  %v1635_v49 = vpack.c.bf16 %v1593_v50, %v1591_v10  ;;  %v1798_v53 = vadd.f32 %v3469_v44, %v1797_v22 }
 0x2cf   : > { %v1436_v13 = vpop.f32.mrf.mxu2 }
 0x2d0   : > { %v1525_v57 = vpop.f32.mrf.mxu3  ;;  %v1887_v31 = vadd.f32 %v1886_v11, %v1798_v53  ;;  %1836 = vmatmul.bf16.gmra.mxu0 %v3425_v20  ;;  %v1437_v55 = vadd.f32 %v1436_v13, %v3389_v51 }
 0x2d1   : > { %1925 = vmatmul.bf16.gmra.mxu1 %v1635_v49 }
 0x2d2   : > { %1960 = vxpose.xlu0.b32.cont [5/16] (narrow) %v1887_v31, 8  ;;  %v1526_v16 = vadd.f32 %v1525_v57, %v1437_v55 }
 0x2d4   : > { %v1595_v34 = vmax.f32 %v1526_v16, 0.0 }
 0x2d5   : > { %v1799_v7 = vpop.f32.mrf.mxu0 }
 0x2d6   : > { %v1888_v8 = vpop.f32.mrf.mxu1  ;;  %v1800_v54 = vadd.f32 %v3469_v44, %v1799_v7 }
 0x2d7   : > { %v1438_v21 = vpop.f32.mrf.mxu2 }
 0x2d8   : > { %v1527_v46 = vpop.f32.mrf.mxu3  ;;  %v1439_v17 = vadd.f32 %v1438_v21, %v3389_v51  ;;  %v1889_v45 = vadd.f32 %v1888_v8, %v1800_v54 }
 0x2da   : > { %v1528_v32 = vadd.f32 %v1527_v46, %v1439_v17  ;;  %1961 = vxpose.xlu0.b32.cont [6/16] (narrow) %v1889_v45, 8 }
 0x2dc   : > { %v1597_v58 = vmax.f32 %v1528_v32, 0.0 }
 0x2dd   : > { %v1802_v1 = vpop.f32.mrf.mxu0 }
 0x2de   : > { %v1891_v20 = vpop.f32.mrf.mxu1  ;;  %v1637_v14 = vpack.c.bf16 %v1597_v58, %v1595_v34  ;;  %v1803_v38 = vadd.f32 %v3469_v44, %v1802_v1 }
 0x2df   : > { %v1441_v40 = vpop.f32.mrf.mxu2 }
 0x2e0   : > { %v1530_v23 = vpop.f32.mrf.mxu3  ;;  %v1892_v39 = vadd.f32 %v1891_v20, %v1803_v38  ;;  %1841 = vmatmul.bf16.gmra.mxu0 %v3434_v25  ;;  %v1442_v37 = vadd.f32 %v1441_v40, %v3389_v51 }
 0x2e1   : > { %1930 = vmatmul.bf16.gmra.mxu1 %v1637_v14 }
 0x2e2   : > { %1962 = vxpose.xlu0.b32.cont [7/16] (narrow) %v1892_v39, 8  ;;  %v1531_v3 = vadd.f32 %v1530_v23, %v1442_v37 }
 0x2e4   : > { %v1599_v9 = vmax.f32 %v1531_v3, 0.0 }
 0x2e5   : > { %v1804_v2 = vpop.f32.mrf.mxu0 }
 0x2e6   : > { %v1893_v18 = vpop.f32.mrf.mxu1  ;;  %v1805_v6 = vadd.f32 %v3469_v44, %v1804_v2 }
 0x2e7   : > { %v1443_v61 = vpop.f32.mrf.mxu2 }
 0x2e8   : > { %v1532_v0 = vpop.f32.mrf.mxu3  ;;  %v1444_v12 = vadd.f32 %v1443_v61, %v3389_v51  ;;  %v1894_v47 = vadd.f32 %v1893_v18, %v1805_v6 }
 0x2ea   : > { %v1533_v52 = vadd.f32 %v1532_v0, %v1444_v12  ;;  %1963 = vxpose.xlu0.b32.cont [8/16] (narrow) %v1894_v47, 8 }
 0x2ec   : > { %v1601_v28 = vmax.f32 %v1533_v52, 0.0 }
 0x2ed   : > { %v1807_v43 = vpop.f32.mrf.mxu0 }
 0x2ee   : > { %v1896_v25 = vpop.f32.mrf.mxu1  ;;  %v1639_v29 = vpack.c.bf16 %v1601_v28, %v1599_v9  ;;  %v1808_v42 = vadd.f32 %v3469_v44, %v1807_v43 }
 0x2ef   : > { %v1446_v19 = vpop.f32.mrf.mxu2 }
 0x2f0   : > { %v1535_v59 = vpop.f32.mrf.mxu3  ;;  %v1897_v60 = vadd.f32 %v1896_v25, %v1808_v42  ;;  %1846 = vmatmul.bf16.gmra.mxu0 %v3443_v26  ;;  %v1447_v30 = vadd.f32 %v1446_v19, %v3389_v51 }
 0x2f1   : > { %1935 = vmatmul.bf16.gmra.mxu1 %v1639_v29 }
 0x2f2   : > { %1964 = vxpose.xlu0.b32.cont [9/16] (narrow) %v1897_v60, 8  ;;  %v1536_v33 = vadd.f32 %v1535_v59, %v1447_v30 }
 0x2f4   : > { %v1603_v56 = vmax.f32 %v1536_v33, 0.0 }
 0x2f5   : > { %v1809_v15 = vpop.f32.mrf.mxu0 }
 0x2f6   : > { %v1898_v35 = vpop.f32.mrf.mxu1  ;;  %v1810_v27 = vadd.f32 %v3469_v44, %v1809_v15 }
 0x2f7   : > { %v1448_v48 = vpop.f32.mrf.mxu2 }
 0x2f8   : > { %v1537_v4 = vpop.f32.mrf.mxu3  ;;  %v1899_v63 = vadd.f32 %v1898_v35, %v1810_v27  ;;  %v1449_v36 = vadd.f32 %v1448_v48, %v3389_v51 }
 0x2fa   : > { %v1538_v5 = vadd.f32 %v1537_v4, %v1449_v36  ;;  %1965 = vxpose.xlu0.b32.cont [10/16] (narrow) %v1899_v63, 8 }
 0x2fc   : > { %v1605_v10 = vmax.f32 %v1538_v5, 0.0 }
 0x2fd   : > { %v1812_v50 = vpop.f32.mrf.mxu0 }
 0x2fe   : > { %v1901_v26 = vpop.f32.mrf.mxu1  ;;  %v1641_v22 = vpack.c.bf16 %v1605_v10, %v1603_v56  ;;  %v1813_v11 = vadd.f32 %v3469_v44, %v1812_v50 }
 0x2ff   : > { %v1451_v49 = vpop.f32.mrf.mxu2 }
 0x300   : > { %v1540_v53 = vpop.f32.mrf.mxu3  ;;  %v1902_v13 = vadd.f32 %v1901_v26, %v1813_v11  ;;  %1851 = vmatmul.bf16.gmra.mxu0 %v3452_v41  ;;  %v1452_v57 = vadd.f32 %v1451_v49, %v3389_v51 }
 0x301   : > { %1940 = vmatmul.bf16.gmra.mxu1 %v1641_v22 }
 0x302   : > { %1966 = vxpose.xlu0.b32.cont [11/16] (narrow) %v1902_v13, 8  ;;  %v1541_v21 = vadd.f32 %v1540_v53, %v1452_v57 }
 0x304   : > { %v1607_v45 = vmax.f32 %v1541_v21, 0.0 }
 0x305   : > { %v1814_v31 = vpop.f32.mrf.mxu0 }
 0x306   : > { %v1903_v55 = vpop.f32.mrf.mxu1  ;;  %v1815_v7 = vadd.f32 %v3469_v44, %v1814_v31 }
 0x307   : > { %v1453_v8 = vpop.f32.mrf.mxu2 }
 0x308   : > { %v1542_v54 = vpop.f32.mrf.mxu3  ;;  %v1904_v46 = vadd.f32 %v1903_v55, %v1815_v7  ;;  %v1454_v16 = vadd.f32 %v1453_v8, %v3389_v51 }
 0x30a   : > { %v1543_v17 = vadd.f32 %v1542_v54, %v1454_v16  ;;  %1967 = vxpose.xlu0.b32.cont [12/16] (narrow) %v1904_v46, 8 }
 0x30c   : > { %v1609_v32 = vmax.f32 %v1543_v17, 0.0 }
 0x30d   : > { %v1817_v34 = vpop.f32.mrf.mxu0 }
 0x30e   : > { %v1906_v41 = vpop.f32.mrf.mxu1  ;;  %v1643_v58 = vpack.c.bf16 %v1609_v32, %v1607_v45  ;;  %v1818_v1 = vadd.f32 %v3469_v44, %v1817_v34 }
 0x30f   : > { %v1456_v20 = vpop.f32.mrf.mxu2 }
 0x310   : > { %v1545_v14 = vpop.f32.mrf.mxu3  ;;  %v1907_v38 = vadd.f32 %v1906_v41, %v1818_v1  ;;  %1856 = vmatmul.bf16.gmra.mxu0 %v3459_v24  ;;  %v1457_v40 = vadd.f32 %v1456_v20, %v3389_v51 }
 0x311   : > { %1945 = vmatmul.bf16.gmra.mxu1 %v1643_v58 }
 0x312   : > { %1968 = vxpose.xlu0.b32.cont [13/16] (narrow) %v1907_v38, 8  ;;  %v1546_v18 = vadd.f32 %v1545_v14, %v1457_v40 }
 0x314   : > { %v1611_v12 = vmax.f32 %v1546_v18, 0.0 }
 0x315   : > { %v1819_v23 = vpop.f32.mrf.mxu0 }
 0x316   : > { %v1908_v39 = vpop.f32.mrf.mxu1  ;;  %v1820_v37 = vadd.f32 %v3469_v44, %v1819_v23 }
 0x317   : > { %v1458_v2 = vpop.f32.mrf.mxu2 }
 0x318   : > { %v1909_v6 = vadd.f32 %v1908_v39, %v1820_v37  ;;  %v1459_v61 = vadd.f32 %v1458_v2, %v3389_v51  ;;  %v1547_v0 = vpop.f32.mrf.mxu3 }
 0x31a   : > { %v1548_v3 = vadd.f32 %v1547_v0, %v1459_v61  ;;  %1969 = vxpose.xlu0.b32.cont [14/16] (narrow) %v1909_v6, 8 }
 0x31c   : > { %v1613_v47 = vmax.f32 %v1548_v3, 0.0 }
 0x31d   : > { %v1822_v52 = vpop.f32.mrf.mxu0 }
 0x31e   : > { %v1911_v24 = vpop.f32.mrf.mxu1  ;;  %v1645_v9 = vpack.c.bf16 %v1613_v47, %v1611_v12  ;;  %v1823_v28 = vadd.f32 %v3469_v44, %v1822_v52 }
 0x320   : > { %v1912_v43 = vadd.f32 %v1911_v24, %v1823_v28  ;;  %1861 = vmatmul.bf16.gmra.mxu0 %v3471_v62 }
 0x321   : > { %1950 = vmatmul.bf16.gmra.mxu1 %v1645_v9 }
 0x322   : > { %1970 = vxpose.xlu0.b32.cont [15/16] (narrow) %v1912_v43, 8 }
 0x325   : > { %v1824_v25 = vpop.f32.mrf.mxu0 }
 0x326   : > { %v1913_v29 = vpop.f32.mrf.mxu1  ;;  %v1825_v42 = vadd.f32 %v3469_v44, %v1824_v25 }
 0x328   : > { %v1914_v51 = vadd.f32 %v1913_v29, %v1825_v42 }
 0x32a   : > { %1971 = vxpose.xlu0.b32.end [16/16] (narrow) %v1914_v51, 8 }
 0x32d   : > { %v1827_v19 = vpop.f32.mrf.mxu0 }
 0x32e   : > { %v1916_v59 = vpop.f32.mrf.mxu1  ;;  %v1828_v60 = vadd.f32 %v3469_v44, %v1827_v19 }
 0x330   : > { %v1917_v30 = vadd.f32 %v1916_v59, %v1828_v60 }
 0x332   : > { %1988 = vxpose.xlu1.b32.start [1/16] (narrow) %v1917_v30, 8 }
 0x335   : > { %v1829_v15 = vpop.f32.mrf.mxu0 }
 0x336   : > { %v1918_v35 = vpop.f32.mrf.mxu1  ;;  %v1830_v27 = vadd.f32 %v3469_v44, %v1829_v15 }
 0x338   : > { %v1919_v48 = vadd.f32 %v1918_v35, %v1830_v27 }
 0x33a   : > { %1989 = vxpose.xlu1.b32.cont [2/16] (narrow) %v1919_v48, 8 }
 0x33d   : > { %v1832_v62 = vpop.f32.mrf.mxu0 }
 0x33e   : > { %v1921_v4 = vpop.f32.mrf.mxu1  ;;  %v1833_v33 = vadd.f32 %v3469_v44, %v1832_v62 }
 0x340   : > { %v1922_v63 = vadd.f32 %v1921_v4, %v1833_v33 }
 0x342   : > { %1990 = vxpose.xlu1.b32.cont [3/16] (narrow) %v1922_v63, 8 }
 0x345   : > { %v1834_v36 = vpop.f32.mrf.mxu0 }
 0x346   : > { %v1923_v5 = vpop.f32.mrf.mxu1  ;;  %v1835_v56 = vadd.f32 %v3469_v44, %v1834_v36 }
 0x348   : > { %v1924_v10 = vadd.f32 %v1923_v5, %v1835_v56 }
 0x34a   : > { %1991 = vxpose.xlu1.b32.cont [4/16] (narrow) %v1924_v10, 8 }
 0x34d   : > { %v1837_v50 = vpop.f32.mrf.mxu0 }
 0x34e   : > { %v1926_v26 = vpop.f32.mrf.mxu1  ;;  %v1838_v22 = vadd.f32 %v3469_v44, %v1837_v50 }
 0x350   : > { %v1927_v11 = vadd.f32 %v1926_v26, %v1838_v22 }
 0x352   : > { %1992 = vxpose.xlu1.b32.cont [5/16] (narrow) %v1927_v11, 8 }
 0x355   : > { %v1839_v49 = vpop.f32.mrf.mxu0 }
 0x356   : > { %v1928_v53 = vpop.f32.mrf.mxu1  ;;  %v1840_v13 = vadd.f32 %v3469_v44, %v1839_v49  ;;  %v1972_v60 = vpop.trf.xlu0 }
 0x358   : > { %v1929_v57 = vadd.f32 %v1928_v53, %v1840_v13 }
 0x35a   : > { %1993 = vxpose.xlu1.b32.cont [6/16] (narrow) %v1929_v57, 8 }
 0x35d   : > { %v1842_v31 = vpop.f32.mrf.mxu0 }
 0x35e   : > { %v1931_v55 = vpop.f32.mrf.mxu1  ;;  %v1843_v7 = vadd.f32 %v3469_v44, %v1842_v31 }
 0x360   : > { %v1932_v8 = vadd.f32 %v1931_v55, %v1843_v7 }
 0x362   : > { %1994 = vxpose.xlu1.b32.cont [7/16] (narrow) %v1932_v8, 8 }
 0x365   : > { %v1844_v54 = vpop.f32.mrf.mxu0 }
 0x366   : > { %v1933_v21 = vpop.f32.mrf.mxu1  ;;  %v1845_v46 = vadd.f32 %v3469_v44, %v1844_v54 }
 0x368   : > { %v1934_v16 = vadd.f32 %v1933_v21, %v1845_v46 }
 0x36a   : > { %1995 = vxpose.xlu1.b32.cont [8/16] (narrow) %v1934_v16, 8 }
 0x36d   : > { %v1847_v17 = vpop.f32.mrf.mxu0 }
 0x36e   : > { %v1936_v45 = vpop.f32.mrf.mxu1  ;;  %v1848_v32 = vadd.f32 %v3469_v44, %v1847_v17 }
 0x370   : > { %v1937_v34 = vadd.f32 %v1936_v45, %v1848_v32 }
 0x372   : > { %1996 = vxpose.xlu1.b32.cont [9/16] (narrow) %v1937_v34, 8 }
 0x375   : > { %v1849_v41 = vpop.f32.mrf.mxu0 }
 0x376   : > { %v1938_v58 = vpop.f32.mrf.mxu1  ;;  %v1850_v1 = vadd.f32 %v3469_v44, %v1849_v41 }
 0x378   : > { %v1939_v20 = vadd.f32 %v1938_v58, %v1850_v1 }
 0x37a   : > { %1997 = vxpose.xlu1.b32.cont [10/16] (narrow) %v1939_v20, 8 }
 0x37d   : > { %v1852_v14 = vpop.f32.mrf.mxu0 }
 0x37e   : > { %v1941_v38 = vpop.f32.mrf.mxu1  ;;  %v1853_v40 = vadd.f32 %v3469_v44, %v1852_v14 }
 0x380   : > { %v1942_v23 = vadd.f32 %v1941_v38, %v1853_v40 }
 0x382   : > { %1998 = vxpose.xlu1.b32.cont [11/16] (narrow) %v1942_v23, 8 }
 0x385   : > { %v1854_v39 = vpop.f32.mrf.mxu0 }
 0x386   : > { %v1943_v37 = vpop.f32.mrf.mxu1  ;;  %v1855_v2 = vadd.f32 %v3469_v44, %v1854_v39 }
 0x388   : > { %v1944_v18 = vadd.f32 %v1943_v37, %v1855_v2 }
 0x38a   : > { %1999 = vxpose.xlu1.b32.cont [12/16] (narrow) %v1944_v18, 8 }
 0x38d   : > { %v1857_v6 = vpop.f32.mrf.mxu0 }
 0x38e   : > { %v1946_v61 = vpop.f32.mrf.mxu1  ;;  %v1858_v0 = vadd.f32 %v3469_v44, %v1857_v6 }
 0x390   : > { %v1947_v3 = vadd.f32 %v1946_v61, %v1858_v0 }
 0x392   : > { %2000 = vxpose.xlu1.b32.cont [13/16] (narrow) %v1947_v3, 8 }
 0x395   : > { %v1859_v12 = vpop.f32.mrf.mxu0 }
 0x396   : > { %v1948_v47 = vpop.f32.mrf.mxu1  ;;  %v1860_v52 = vadd.f32 %v3469_v44, %v1859_v12 }
 0x398   : > { %v1949_v24 = vadd.f32 %v1948_v47, %v1860_v52 }
 0x39a   : > { %2001 = vxpose.xlu1.b32.cont [14/16] (narrow) %v1949_v24, 8 }
 0x39d   : > { %v1862_v9 = vpop.f32.mrf.mxu0 }
 0x39e   : > { %v1951_v28 = vpop.f32.mrf.mxu1  ;;  %v1863_v43 = vadd.f32 %v3469_v44, %v1862_v9 }
 0x3a0   : > { %v1952_v25 = vadd.f32 %v1951_v28, %v1863_v43 }
 0x3a2   : > { %2002 = vxpose.xlu1.b32.cont [15/16] (narrow) %v1952_v25, 8 }
 0x3a5   : > { %v1864_v29 = vpop.f32.mrf.mxu0 }
 0x3a6   : > { %v1865_v42 = vadd.f32 %v3469_v44, %v1864_v29  ;;  %v1953_v51 = vpop.f32.mrf.mxu1 }
 0x3a8   : > { %v1954_v19 = vadd.f32 %v1953_v51, %v1865_v42 }
 0x3aa   : > { %2003 = vxpose.xlu1.b32.end [16/16] (narrow) %v1954_v19, 8 }
 0x3d6   : > { %v2004_v59 = vpop.trf.xlu1 }
 0x3d7   : > { %v2021_v30 = vrot.slane %v2004_v59, 7 }
 0x3d9   : > { %v2024_v15 = vsel %vm2023_vm2, %v1972_v60, %v2021_v30 }
 0x3da   : > { %v2399_v35 = vmul.f32 -1.442695, %v2024_v15 }
 0x3dc   : > { %2498 = vpow2.f32 %v2399_v35 }
 0x3e2   : > { %v2499_v27 = vpop.eup %2498 }
 0x3e3   : > { %v2028_v48 = vadd.f32 1.0, %v2499_v27 }
 0x3e5   : > { %2500 = vrcp.f32 %v2028_v48  ;;  %v2040_v33 = vand.u32 2147483648, %v2028_v48  ;;  %v2038_v36 = vand.u32 2147483647, %v2028_v48  ;;  %vm2034_vm4 = vweird.f32 %v2028_v48 }
 0x3e7   : > { %v2041_v56 = vor.u32 1.1754944e-38, %v2040_v33  ;;  %vm2039_vm6 = vcmp.eq.f32.partialorder %v2038_v36, 8.507059e+37 }
 0x3eb   : > { %v2501_v62 = vpop.eup %2500 }
 0x3ec   : > { %v2030_v4 = vmul.f32 %v2501_v62, %v2028_v48  ;;  %vm2035_vm3 = vweird.f32 %v2501_v62 }
 0x3ed   : > { %vm2036_vm5 = vmor %vm2034_vm4, %vm2035_vm3 }
 0x3ee   : > { %v2031_v44 = vsub.f32 1.0, %v2030_v4 }
 0x3f0   : > { %v2032_v63 = vmul.f32 %v2501_v62, %v2031_v44 }
 0x3f2   : > { %v2033_v5 = vadd.f32 %v2501_v62, %v2032_v63 }
 0x3f4   : > { %v2037_v10 = vsel %vm2036_vm5, %v2501_v62, %v2033_v5 }
 0x3f5   : > { %v2042_v50 = vsel %vm2039_vm6, %v2041_v56, %v2037_v10 }
 0x3f6   : > { %2044 = vst [vmem:[%s272_s15] sm:$0x3] %v2042_v50 }
 0x3f7   : > { %2529 = shalt.err (!%p2526_p3)
}
 0x3f8   : > { %2458 = dma.vmem_to_hbm [thread:$0]  (%p2644_p5), %s2059_s16, 32, %s2061_s18, %s2046_s28  }
 0x3f9 PF: > { %p2464_p4 = scmp.ge.s32.totalorder %s2564_s27, 2  ;;  %s2072_s29 = sand.u32 1, %s2552_s24  }
 0x3fa   : > { %s2073_s9 = scalar_lea.sflag [#allocation3], %s2072_s29 }
 0x3fb   : > { %p2461_p7 = pnand %p2464_p4, %p2648_p6 }
 0x3fd   : > { %p2462_p8 = pneg %p2461_p7 }
 0x3ff   : > { %2547 = dma.done.wait (%p2462_p8), %s2073_s9, 32  }
 0x400   : > { %2549 = vsyncadd (%p2462_p8), %s2073_s9, 4294967264  ;;  %p17_p9 = scmp.ge.s32.totalorder %s2631_s30, 4   ;;  %s3579_s24 = smov %s2556_s25 }
 0x401   : > { %s3580_s25 = smov %s2560_s26  ;;  %s3581_s26 = smov %s2642_s10 }
 0x402   : > { %s3582_s27 = smov %s2631_s30  ;;  %19 = sbr.rel (!%p17_p9) target bundleno = 3 (0x3), region = 83 }
 0x407   :  { %2079 = vsyncpa [#allocation3], 1 }
 0x408   :  { %2081 = vsyncpa [#allocation3 + $0x1], 1 }

</bundles_post_ra>
